<compile_context>
chip_gen: v7x
topology: tpu7x:2x2x1
jax: 0.10.0
libtpu: 0.0.40
codegen_flags: <defaults>
</compile_context>

<pallas_src>
import jax
import jax.numpy as jnp
from jax import lax
from jax.experimental import pallas as pl
from jax.experimental.pallas import tpu as pltpu

LEAKY_ALPHA = 0.2


def _round_up(v, m):
    return ((v + m - 1) // m) * m


def _leaky_relu(v, alpha):
    # max-form leaky relu (valid for 0 < alpha < 1): mul + max instead of cmp+mul+select.
    return jnp.maximum(v, alpha * v)


def _mx(v):
    # MXU operand dtype: explicit bf16 -> guaranteed single-pass native MXU path
    # (accumulation stays f32 via preferred_element_type at the dot).
    return v.astype(jnp.bfloat16)


def _pad_cols(a, to):
    if a.shape[-1] >= to:
        return a
    return jnp.pad(a, ((0, 0), (0, to - a.shape[-1])))


# ------------------------------- fused kernel --------------------------------

def _make_fused_mpnet_kernel(layer_counts, b_tile, n_pad, n_real, alpha, edge_dtype):
    """Kernel refs: (x_ref, *param_refs, out_ref).

    Per MP layer the flattened params come in this order (all 2-D, pre-split in wrapper):
      fe:  W0_i (F,H0), W0_j (F,H0), b0 (1,H0), then [Wk, bk] for remaining fe layers
      fn:  Wn0_agg (fe_out,G0), Wn0_x (F,G0), bn0 (1,G0), then [Wk, bk] remaining fn layers
    """
    BT, Np = b_tile, n_pad

    def kernel(x_ref, *refs):
        out_ref = refs[-1]
        params = refs[:-1]

        xf = x_ref[...]                                    # (BT*Np, F) float32

        idx = 0
        for (num_fe, num_fn) in layer_counts:
            # ---------------- edge network fe ----------------
            # First fe layer without materializing the (N^2, 2F) concat:
            #   A[b,i,j] = x[b,i] @ W0_i + x[b,j] @ W0_j + b0
            w0i = params[idx][...]
            w0j = params[idx + 1][...]
            b0 = params[idx + 2][...]
            idx += 3
            h0 = w0i.shape[-1]

            xb = _mx(xf)                                   # reused for fe and fn dots
            yi = jnp.dot(xb, w0i, preferred_element_type=jnp.float32)
            yj = jnp.dot(xb, w0j, preferred_element_type=jnp.float32) + b0
            yi3 = yi.reshape(BT, Np, h0).astype(edge_dtype)
            yj3 = yj.reshape(BT, Np, h0).astype(edge_dtype)
            # Dominant VPU work: broadcast-add + leaky on the (BT,Np,Np,H) edge tensor,
            # done in edge_dtype (bf16 on v6e/v7x, f32 on v5e).
            a = _leaky_relu(yi3[:, :, None, :] + yj3[:, None, :, :], alpha)
            a = a.reshape(BT * Np * Np, h0)

            for _ in range(num_fe - 1):
                w = params[idx][...]
                b = params[idx + 1][...]
                idx += 2
                a = jnp.dot(_mx(a), w, preferred_element_type=jnp.float32) + b
                a = _leaky_relu(a.astype(edge_dtype), alpha)

            fe_out = a.shape[-1]
            a3 = a.reshape(BT * Np, Np, fe_out)
            if Np != n_real:
                # Zero the padded j-columns before the neighbour sum (static mask,
                # constant-folded by the compiler).
                jmask = (lax.broadcasted_iota(jnp.int32, (Np, fe_out), 0)
                         < n_real).astype(a3.dtype)
                a3 = a3 * jmask[None]
            # Sum aggregation over neighbours j (MPLayer default sum=True); f32 accum.
            agg = a3.astype(jnp.float32).sum(axis=1)       # (BT*Np, fe_out)

            # ---------------- node network fn ----------------
            # First fn layer without the (fe_out + F)-lane concat.
            wna = params[idx][...]
            wnx = params[idx + 1][...]
            bn0 = params[idx + 2][...]
            idx += 3
            h = (jnp.dot(_mx(agg), wna, preferred_element_type=jnp.float32)
                 + jnp.dot(xb, wnx, preferred_element_type=jnp.float32)
                 + bn0)
            if num_fn > 1:                                 # final_linear=True
                h = _leaky_relu(h, alpha)
            for li in range(num_fn - 1):
                w = params[idx][...]
                b = params[idx + 1][...]
                idx += 2
                h = jnp.dot(_mx(h), w, preferred_element_type=jnp.float32) + b
                if li != num_fn - 2:                       # no leaky after last layer
                    h = _leaky_relu(h, alpha)

            xf = h                                         # (BT*Np, out_l) f32 -> next layer

        out_ref[...] = xf.astype(out_ref.dtype)

    return kernel


# --------------------------- parameter preparation ---------------------------

def _flatten_mpnet_params(mp_params, input_node_size):
    """Split first fe/fn weights (to avoid in-kernel concats) and flatten everything.

    Weights are stored bf16 (MXU operands), biases f32 (added to f32 accumulators).
    """
    flat, layer_counts = [], []
    feat = input_node_size
    for fe_params, fn_params in mp_params:
        num_fe, num_fn = len(fe_params), len(fn_params)
        layer_counts.append((num_fe, num_fn))

        w0, b0 = fe_params[0]
        assert w0.shape[0] == 2 * feat, (w0.shape, feat)
        flat += [w0[:feat].astype(jnp.bfloat16),
                 w0[feat:].astype(jnp.bfloat16),
                 b0.reshape(1, -1).astype(jnp.float32)]
        for w, b in fe_params[1:]:
            flat += [w.astype(jnp.bfloat16), b.reshape(1, -1).astype(jnp.float32)]

        fe_out = fe_params[-1][0].shape[1]
        wn0, bn0 = fn_params[0]
        assert wn0.shape[0] == fe_out + feat, (wn0.shape, fe_out, feat)
        flat += [wn0[:fe_out].astype(jnp.bfloat16),
                 wn0[fe_out:].astype(jnp.bfloat16),
                 bn0.reshape(1, -1).astype(jnp.float32)]
        for w, b in fn_params[1:]:
            flat += [w.astype(jnp.bfloat16), b.reshape(1, -1).astype(jnp.float32)]

        feat = fn_params[-1][0].shape[1]
    return flat, layer_counts, feat


def _tpu_defaults():
    """Generation-aware edge-elementwise dtype, activation VMEM budget, scoped limit."""
    try:
        kind = jax.devices()[0].device_kind.lower()
    except Exception:
        kind = ""
    bf16_vpu = ("v6" in kind) or ("v7" in kind)     # v5e has no bf16 VALUs
    edge_dtype = jnp.bfloat16 if bf16_vpu else jnp.float32
    if ("v5" in kind) or ("v6" in kind):
        phys = 128 * 1024 * 1024
    elif "v7" in kind:
        phys = 64 * 1024 * 1024
    else:
        phys = None                                  # unknown chip: stay conservative
    if phys is not None:
        act_budget = (phys * 3) // 8                 # ~37.5% of physical VMEM for activations
        vmem_limit = (phys * 3) // 4                 # raise the 16/32 MiB scoped default
    else:
        act_budget = 8 * 1024 * 1024
        vmem_limit = None
    return edge_dtype, act_budget, vmem_limit


def _pick_batch_tile(batch, n_pad, max_fe_width, edge_bytes, budget_bytes):
    """Largest divisor of `batch` whose per-step edge activations fit the VMEM budget.

    Footprint model: widest fe layer lane-rounded to 128, ~2 edge-dtype temporaries plus
    one f32 temporary live simultaneously. Tile is also capped so the grid has >= 2 steps
    (the single "parallel" grid axis is the only source of v7x dual-TensorCore use).
    """
    w_pad = _round_up(max_fe_width, 128)
    per_b = n_pad * n_pad * w_pad * (2 * edge_bytes + 8)
    bt = max(1, min(batch, budget_bytes // max(per_b, 1)))
    if batch >= 2:
        bt = min(bt, batch // 2)
    bt = max(bt, 1)
    while batch % bt != 0:
        bt -= 1
    return bt


# --------------------------------- forward -----------------------------------

def mpnet_forward(x, mp_params, *, alpha=LEAKY_ALPHA, batch_tile=None,
                  edge_dtype=None, vmem_limit_bytes=None):
    """Fused MPNet forward (all mp_iters layers in ONE pallas_call): (B,N,F) -> (B,N,out).

    Base MPNet has no pre/post-mp, no mask, clabels=0, final_activation='' (identity).
    """
    B, N, F = x.shape
    auto_edge, act_budget, auto_vmem = _tpu_defaults()
    edge_dtype = auto_edge if edge_dtype is None else edge_dtype
    vmem_limit_bytes = auto_vmem if vmem_limit_bytes is None else vmem_limit_bytes

    flat_params, layer_counts, out_size = _flatten_mpnet_params(mp_params, F)

    # Pad the final fn layer's output to a multiple of 128 lanes -> dense output stores.
    out_pad = _round_up(out_size, 128)
    if out_pad != out_size:
        n_tail = 2 if layer_counts[-1][1] > 1 else 3
        for t in range(1, n_tail + 1):
            flat_params[-t] = _pad_cols(flat_params[-t], out_pad)

    # Pad the node axis to the sublane tile of the edge dtype so all edge-tensor
    # reshapes and the neighbour reduction stay view-like.
    sub = 16 if edge_dtype == jnp.bfloat16 else 8
    n_pad = _round_up(N, sub)

    max_fe_w = max(w.shape[1] for fe_params, _ in mp_params for w, _ in fe_params)
    edge_bytes = jnp.dtype(edge_dtype).itemsize
    bt = (batch_tile if batch_tile is not None
          else _pick_batch_tile(B, n_pad, max_fe_w, edge_bytes, act_budget))
    assert B % bt == 0, (B, bt)

    # f32 kernel input (tiny: B*N*F) keeps the 8-sublane block layout simple; operands
    # are cast to bf16 in-kernel right before each dot.
    x_pad = x.astype(jnp.float32)
    if n_pad != N:
        x_pad = jnp.pad(x_pad, ((0, 0), (0, n_pad - N), (0, 0)))
    x_flat = x_pad.reshape(B * n_pad, F)

    kernel = _make_fused_mpnet_kernel(layer_counts, bt, n_pad, N, alpha, edge_dtype)

    in_specs = [pl.BlockSpec((bt * n_pad, F), lambda b: (b, 0))]
    # Weights/biases are grid-invariant whole-array blocks (constant index map); they
    # live in VMEM for the whole kernel (a few hundred KB in bf16 for MPGAN sizes).
    # TODO(synk): single-buffer these grid-invariant params (pipeline_mode=pl.Buffered(1))
    # to trim the redundant double-buffer copies.
    for p in flat_params:
        in_specs.append(pl.BlockSpec(p.shape, lambda b: (0, 0)))
    out_spec = pl.BlockSpec((bt * n_pad, out_pad), lambda b: (b, 0))

    cp_kwargs = dict(dimension_semantics=("parallel",))
    if vmem_limit_bytes is not None:
        cp_kwargs["vmem_limit_bytes"] = int(vmem_limit_bytes)

    out_flat = pl.pallas_call(
        kernel,
        out_shape=jax.ShapeDtypeStruct((B * n_pad, out_pad), jnp.float32),
        grid_spec=pltpu.PrefetchScalarGridSpec(
            num_scalar_prefetch=0,
            grid=(B // bt,),
            in_specs=in_specs,
            out_specs=out_spec,
        ),
        compiler_params=pltpu.CompilerParams(**cp_kwargs),
    )(x_flat, *flat_params)

    return out_flat.reshape(B, n_pad, out_pad)[:, :N, :out_size]


# ----------------------- deterministic parameter init -----------------------

def _init_linear(key, fan_in, fan_out):
    kw, kb = jax.random.split(key)
    bound = 1.0 / (fan_in ** 0.5)
    w = jax.random.uniform(kw, (fan_in, fan_out), jnp.float32, -bound, bound)
    b = jax.random.uniform(kb, (fan_out,), jnp.float32, -bound, bound)
    return w, b


def _init_linear_net(key, layer_sizes):
    params = []
    for i in range(len(layer_sizes) - 1):
        key, sub = jax.random.split(key)
        params.append(_init_linear(sub, layer_sizes[i], layer_sizes[i + 1]))
    return params


def _init_mp_layer(key, input_node_size, fe_layers, fn_layers, output_node_size):
    # pos_diffs=False -> num_ef=0; clabels=0; mask_fne_np=False
    fe_in = 2 * input_node_size
    kfe, kfn = jax.random.split(key)
    fe_params = _init_linear_net(kfe, [fe_in] + list(fe_layers))
    fn_in = fe_layers[-1] + input_node_size
    fn_params = _init_linear_net(kfn, [fn_in] + list(fn_layers) + [output_node_size])
    return fe_params, fn_params


def init_mpnet(key, input_node_size, mp_iters, fe_layers, fn_layers,
               hidden_node_size, output_node_size=0):
    output_node_size = output_node_size if output_node_size > 0 else hidden_node_size
    in_sizes = [input_node_size] + [hidden_node_size] * (mp_iters - 1)
    out_sizes = [hidden_node_size] * (mp_iters - 1) + [output_node_size]
    params = []
    for i in range(mp_iters):
        key, sub = jax.random.split(key)
        params.append(_init_mp_layer(sub, in_sizes[i], fe_layers, fn_layers, out_sizes[i]))
    return params


# ----------------------------- pure-JAX reference ----------------------------
# Original (concatenate-based, f32) formulation; also validates the split-matmul,
# node-padding and neighbour-mask restructuring inside the kernel.

def _mp_layer_ref(x, fe_params, fn_params, alpha=LEAKY_ALPHA):
    B, N, F = x.shape
    x1 = jnp.broadcast_to(x[:, :, None, :], (B, N, N, F)).reshape(B, N * N, F)
    x2 = jnp.broadcast_to(x[:, None, :, :], (B, N, N, F)).reshape(B, N * N, F)
    A = jnp.concatenate([x1, x2], axis=-1)
    for w, b in fe_params:
        A = jnp.einsum("bef,fo->beo", A, w) + b
        A = jnp.maximum(A, alpha * A)
    A = A.reshape(B, N, N, -1).sum(axis=2)
    h = jnp.concatenate([A, x], axis=-1)
    for li, (w, b) in enumerate(fn_params):
        h = jnp.einsum("bnf,fo->bno", h, w) + b
        if li != len(fn_params) - 1:
            h = jnp.maximum(h, alpha * h)
    return h


def _mpnet_ref(x, mp_params):
    for fe_params, fn_params in mp_params:
        x = _mp_layer_ref(x, fe_params, fn_params)
    return x


# TODO(synk): knn / masked / conditioned MPLayer branches (torch.sort + torch.gather,
# clabels, mask_fne_np) are not exercised by the default MPNet config and are not
# implemented here.

if __name__ == "__main__":
    key = jax.random.PRNGKey(0)
    kx, kp, k2x, k2p = jax.random.split(key, 4)

    # Test 1: batch=4, num_particles=8, input_node_size=3, mp_iters=2,
    # fe_layers=[32, 64], fn_layers=[64], hidden_node_size=16; explicit batch_tile=2
    # -> 2 grid steps on the "parallel" batch axis.
    B, N, F_IN = 4, 8, 3
    MP_ITERS, FE_LAYERS, FN_LAYERS, HIDDEN = 2, [32, 64], [64], 16
    x = jax.random.normal(kx, (B, N, F_IN), jnp.float32)
    params = init_mpnet(kp, F_IN, MP_ITERS, FE_LAYERS, FN_LAYERS, HIDDEN)

    out = jax.block_until_ready(mpnet_forward(x, params, batch_tile=2))
    ref = _mpnet_ref(x, params)
    assert out.shape == (B, N, HIDDEN), out.shape
    # Tolerance covers bf16 MXU operands (+ bf16 edge elementwise on v6e/v7x) vs f32 ref.
    assert jnp.allclose(out, ref, atol=3e-2, rtol=3e-2), (
        float(jnp.max(jnp.abs(out - ref))))

    # Test 2: node count not a multiple of the sublane tile -> exercises node padding
    # and the padded-neighbour mask before aggregation; batch tile auto-picked.
    B2, N2 = 2, 6
    x2 = jax.random.normal(k2x, (B2, N2, F_IN), jnp.float32)
    params2 = init_mpnet(k2p, F_IN, MP_ITERS, [32, 48], [32], HIDDEN)

    out2 = jax.block_until_ready(mpnet_forward(x2, params2))
    ref2 = _mpnet_ref(x2, params2)
    assert out2.shape == (B2, N2, HIDDEN), out2.shape
    assert jnp.allclose(out2, ref2, atol=3e-2, rtol=3e-2), (
        float(jnp.max(jnp.abs(out2 - ref2))))

    print("KERNEL_OK")
</pallas_src>

<mosaic_0001>
module attributes {stable_mosaic.version = 11 : i64} {
  func.func @kernel(%arg0: i32, %arg1: memref<16x3xf32, #tpu.memory_space<vmem>>, %arg2: memref<3x32xbf16, #tpu.memory_space<vmem>>, %arg3: memref<3x32xbf16, #tpu.memory_space<vmem>>, %arg4: memref<1x32xf32, #tpu.memory_space<vmem>>, %arg5: memref<32x64xbf16, #tpu.memory_space<vmem>>, %arg6: memref<1x64xf32, #tpu.memory_space<vmem>>, %arg7: memref<64x64xbf16, #tpu.memory_space<vmem>>, %arg8: memref<3x64xbf16, #tpu.memory_space<vmem>>, %arg9: memref<1x64xf32, #tpu.memory_space<vmem>>, %arg10: memref<64x16xbf16, #tpu.memory_space<vmem>>, %arg11: memref<1x16xf32, #tpu.memory_space<vmem>>, %arg12: memref<16x32xbf16, #tpu.memory_space<vmem>>, %arg13: memref<16x32xbf16, #tpu.memory_space<vmem>>, %arg14: memref<1x32xf32, #tpu.memory_space<vmem>>, %arg15: memref<32x64xbf16, #tpu.memory_space<vmem>>, %arg16: memref<1x64xf32, #tpu.memory_space<vmem>>, %arg17: memref<64x64xbf16, #tpu.memory_space<vmem>>, %arg18: memref<16x64xbf16, #tpu.memory_space<vmem>>, %arg19: memref<1x64xf32, #tpu.memory_space<vmem>>, %arg20: memref<64x128xbf16, #tpu.memory_space<vmem>>, %arg21: memref<1x128xf32, #tpu.memory_space<vmem>>, %arg22: memref<16x128xf32, #tpu.memory_space<vmem>>) attributes {dimension_semantics = [#tpu.dimension_semantics<parallel>], iteration_bounds = array<i64: 2>, scalar_prefetch = 0 : i64, scratch_operands = 0 : i64, tpu.core_type = #tpu.core_type<tc>, window_params = [{transform_indices = @transform_0, window_bounds = array<i64: 16, 3>}, {pipeline_mode = #tpu.pipeline_mode<synchronous>, transform_indices = @transform_1, window_bounds = array<i64: 3, 32>}, {pipeline_mode = #tpu.pipeline_mode<synchronous>, transform_indices = @transform_2, window_bounds = array<i64: 3, 32>}, {pipeline_mode = #tpu.pipeline_mode<synchronous>, transform_indices = @transform_3, window_bounds = array<i64: 1, 32>}, {pipeline_mode = #tpu.pipeline_mode<synchronous>, transform_indices = @transform_4, window_bounds = array<i64: 32, 64>}, {pipeline_mode = #tpu.pipeline_mode<synchronous>, transform_indices = @transform_5, window_bounds = array<i64: 1, 64>}, {pipeline_mode = #tpu.pipeline_mode<synchronous>, transform_indices = @transform_6, window_bounds = array<i64: 64, 64>}, {pipeline_mode = #tpu.pipeline_mode<synchronous>, transform_indices = @transform_7, window_bounds = array<i64: 3, 64>}, {pipeline_mode = #tpu.pipeline_mode<synchronous>, transform_indices = @transform_8, window_bounds = array<i64: 1, 64>}, {pipeline_mode = #tpu.pipeline_mode<synchronous>, transform_indices = @transform_9, window_bounds = array<i64: 64, 16>}, {pipeline_mode = #tpu.pipeline_mode<synchronous>, transform_indices = @transform_10, window_bounds = array<i64: 1, 16>}, {pipeline_mode = #tpu.pipeline_mode<synchronous>, transform_indices = @transform_11, window_bounds = array<i64: 16, 32>}, {pipeline_mode = #tpu.pipeline_mode<synchronous>, transform_indices = @transform_12, window_bounds = array<i64: 16, 32>}, {pipeline_mode = #tpu.pipeline_mode<synchronous>, transform_indices = @transform_13, window_bounds = array<i64: 1, 32>}, {pipeline_mode = #tpu.pipeline_mode<synchronous>, transform_indices = @transform_14, window_bounds = array<i64: 32, 64>}, {pipeline_mode = #tpu.pipeline_mode<synchronous>, transform_indices = @transform_15, window_bounds = array<i64: 1, 64>}, {pipeline_mode = #tpu.pipeline_mode<synchronous>, transform_indices = @transform_16, window_bounds = array<i64: 64, 64>}, {pipeline_mode = #tpu.pipeline_mode<synchronous>, transform_indices = @transform_17, window_bounds = array<i64: 16, 64>}, {pipeline_mode = #tpu.pipeline_mode<synchronous>, transform_indices = @transform_18, window_bounds = array<i64: 1, 64>}, {pipeline_mode = #tpu.pipeline_mode<synchronous>, transform_indices = @transform_19, window_bounds = array<i64: 64, 128>}, {pipeline_mode = #tpu.pipeline_mode<synchronous>, transform_indices = @transform_20, window_bounds = array<i64: 1, 128>}, {transform_indices = @transform_21, window_bounds = array<i64: 16, 128>}]} {
    %c0 = arith.constant 0 : index
    %c0_0 = arith.constant 0 : index
    %0 = vector.load %arg1[%c0, %c0_0] : memref<16x3xf32, #tpu.memory_space<vmem>>, vector<16x3xf32>
    %c0_1 = arith.constant 0 : index
    %c0_2 = arith.constant 0 : index
    %1 = vector.load %arg2[%c0_1, %c0_2] : memref<3x32xbf16, #tpu.memory_space<vmem>>, vector<3x32xbf16>
    %c0_3 = arith.constant 0 : index
    %c0_4 = arith.constant 0 : index
    %2 = vector.load %arg3[%c0_3, %c0_4] : memref<3x32xbf16, #tpu.memory_space<vmem>>, vector<3x32xbf16>
    %c0_5 = arith.constant 0 : index
    %c0_6 = arith.constant 0 : index
    %3 = vector.load %arg4[%c0_5, %c0_6] : memref<1x32xf32, #tpu.memory_space<vmem>>, vector<1x32xf32>
    %4 = arith.truncf %0 : vector<16x3xf32> to vector<16x3xbf16>
    %cst = arith.constant dense<0.000000e+00> : vector<16x32xf32>
    %5 = tpu.matmul %4, %1, %cst {dimension_numbers = #tpu.dot_dimension_numbers<[1], [0], [0], [1], [0, 0, 1, 1], [], []>} : vector<16x3xbf16>, vector<3x32xbf16>, vector<16x32xf32> -> vector<16x32xf32>
    %cst_7 = arith.constant dense<0.000000e+00> : vector<16x32xf32>
    %6 = tpu.matmul %4, %2, %cst_7 {dimension_numbers = #tpu.dot_dimension_numbers<[1], [0], [0], [1], [0, 0, 1, 1], [], []>} : vector<16x3xbf16>, vector<3x32xbf16>, vector<16x32xf32> -> vector<16x32xf32>
    %7 = vector.broadcast %3 : vector<1x32xf32> to vector<16x32xf32>
    %8 = arith.addf %6, %7 : vector<16x32xf32>
    %9 = vector.shape_cast %5 : vector<16x32xf32> to vector<2x8x32xf32>
    %10 = vector.shape_cast %8 : vector<16x32xf32> to vector<2x8x32xf32>
    %11 = vector.shape_cast %9 : vector<2x8x32xf32> to vector<2x8x1x32xf32>
    %12 = vector.shape_cast %10 : vector<2x8x32xf32> to vector<2x1x8x32xf32>
    %13 = vector.broadcast %11 : vector<2x8x1x32xf32> to vector<2x8x8x32xf32>
    %14 = vector.broadcast %12 : vector<2x1x8x32xf32> to vector<2x8x8x32xf32>
    %15 = arith.addf %13, %14 : vector<2x8x8x32xf32>
    %cst_8 = arith.constant 2.000000e-01 : f32
    %16 = vector.broadcast %cst_8 : f32 to vector<2x8x8x32xf32>
    %17 = arith.mulf %16, %15 : vector<2x8x8x32xf32>
    %18 = arith.maximumf %15, %17 : vector<2x8x8x32xf32>
    %19 = vector.shape_cast %18 : vector<2x8x8x32xf32> to vector<128x32xf32>
    %c0_9 = arith.constant 0 : index
    %c0_10 = arith.constant 0 : index
    %20 = vector.load %arg5[%c0_9, %c0_10] : memref<32x64xbf16, #tpu.memory_space<vmem>>, vector<32x64xbf16>
    %c0_11 = arith.constant 0 : index
    %c0_12 = arith.constant 0 : index
    %21 = vector.load %arg6[%c0_11, %c0_12] : memref<1x64xf32, #tpu.memory_space<vmem>>, vector<1x64xf32>
    %22 = arith.truncf %19 : vector<128x32xf32> to vector<128x32xbf16>
    %cst_13 = arith.constant dense<0.000000e+00> : vector<128x64xf32>
    %23 = tpu.matmul %22, %20, %cst_13 {dimension_numbers = #tpu.dot_dimension_numbers<[1], [0], [0], [1], [0, 0, 1, 1], [], []>} : vector<128x32xbf16>, vector<32x64xbf16>, vector<128x64xf32> -> vector<128x64xf32>
    %24 = vector.broadcast %21 : vector<1x64xf32> to vector<128x64xf32>
    %25 = arith.addf %23, %24 : vector<128x64xf32>
    %cst_14 = arith.constant 2.000000e-01 : f32
    %26 = vector.broadcast %cst_14 : f32 to vector<128x64xf32>
    %27 = arith.mulf %26, %25 : vector<128x64xf32>
    %28 = arith.maximumf %25, %27 : vector<128x64xf32>
    %29 = vector.shape_cast %28 : vector<128x64xf32> to vector<16x8x64xf32>
    %cst_15 = arith.constant dense<0.000000e+00> : vector<16x64xf32>
    %30 = vector.multi_reduction <add>, %29, %cst_15 [1] : vector<16x8x64xf32> to vector<16x64xf32>
    %c0_16 = arith.constant 0 : index
    %c0_17 = arith.constant 0 : index
    %31 = vector.load %arg7[%c0_16, %c0_17] : memref<64x64xbf16, #tpu.memory_space<vmem>>, vector<64x64xbf16>
    %c0_18 = arith.constant 0 : index
    %c0_19 = arith.constant 0 : index
    %32 = vector.load %arg8[%c0_18, %c0_19] : memref<3x64xbf16, #tpu.memory_space<vmem>>, vector<3x64xbf16>
    %c0_20 = arith.constant 0 : index
    %c0_21 = arith.constant 0 : index
    %33 = vector.load %arg9[%c0_20, %c0_21] : memref<1x64xf32, #tpu.memory_space<vmem>>, vector<1x64xf32>
    %34 = arith.truncf %30 : vector<16x64xf32> to vector<16x64xbf16>
    %cst_22 = arith.constant dense<0.000000e+00> : vector<16x64xf32>
    %35 = tpu.matmul %34, %31, %cst_22 {dimension_numbers = #tpu.dot_dimension_numbers<[1], [0], [0], [1], [0, 0, 1, 1], [], []>} : vector<16x64xbf16>, vector<64x64xbf16>, vector<16x64xf32> -> vector<16x64xf32>
    %cst_23 = arith.constant dense<0.000000e+00> : vector<16x64xf32>
    %36 = tpu.matmul %4, %32, %cst_23 {dimension_numbers = #tpu.dot_dimension_numbers<[1], [0], [0], [1], [0, 0, 1, 1], [], []>} : vector<16x3xbf16>, vector<3x64xbf16>, vector<16x64xf32> -> vector<16x64xf32>
    %37 = arith.addf %35, %36 : vector<16x64xf32>
    %38 = vector.broadcast %33 : vector<1x64xf32> to vector<16x64xf32>
    %39 = arith.addf %37, %38 : vector<16x64xf32>
    %cst_24 = arith.constant 2.000000e-01 : f32
    %40 = vector.broadcast %cst_24 : f32 to vector<16x64xf32>
    %41 = arith.mulf %40, %39 : vector<16x64xf32>
    %42 = arith.maximumf %39, %41 : vector<16x64xf32>
    %c0_25 = arith.constant 0 : index
    %c0_26 = arith.constant 0 : index
    %43 = vector.load %arg10[%c0_25, %c0_26] : memref<64x16xbf16, #tpu.memory_space<vmem>>, vector<64x16xbf16>
    %c0_27 = arith.constant 0 : index
    %c0_28 = arith.constant 0 : index
    %44 = vector.load %arg11[%c0_27, %c0_28] : memref<1x16xf32, #tpu.memory_space<vmem>>, vector<1x16xf32>
    %45 = arith.truncf %42 : vector<16x64xf32> to vector<16x64xbf16>
    %cst_29 = arith.constant dense<0.000000e+00> : vector<16x16xf32>
    %46 = tpu.matmul %45, %43, %cst_29 {dimension_numbers = #tpu.dot_dimension_numbers<[1], [0], [0], [1], [0, 0, 1, 1], [], []>} : vector<16x64xbf16>, vector<64x16xbf16>, vector<16x16xf32> -> vector<16x16xf32>
    %47 = vector.broadcast %44 : vector<1x16xf32> to vector<16x16xf32>
    %48 = arith.addf %46, %47 : vector<16x16xf32>
    %c0_30 = arith.constant 0 : index
    %c0_31 = arith.constant 0 : index
    %49 = vector.load %arg12[%c0_30, %c0_31] : memref<16x32xbf16, #tpu.memory_space<vmem>>, vector<16x32xbf16>
    %c0_32 = arith.constant 0 : index
    %c0_33 = arith.constant 0 : index
    %50 = vector.load %arg13[%c0_32, %c0_33] : memref<16x32xbf16, #tpu.memory_space<vmem>>, vector<16x32xbf16>
    %c0_34 = arith.constant 0 : index
    %c0_35 = arith.constant 0 : index
    %51 = vector.load %arg14[%c0_34, %c0_35] : memref<1x32xf32, #tpu.memory_space<vmem>>, vector<1x32xf32>
    %52 = arith.truncf %48 : vector<16x16xf32> to vector<16x16xbf16>
    %cst_36 = arith.constant dense<0.000000e+00> : vector<16x32xf32>
    %53 = tpu.matmul %52, %49, %cst_36 {dimension_numbers = #tpu.dot_dimension_numbers<[1], [0], [0], [1], [0, 0, 1, 1], [], []>} : vector<16x16xbf16>, vector<16x32xbf16>, vector<16x32xf32> -> vector<16x32xf32>
    %cst_37 = arith.constant dense<0.000000e+00> : vector<16x32xf32>
    %54 = tpu.matmul %52, %50, %cst_37 {dimension_numbers = #tpu.dot_dimension_numbers<[1], [0], [0], [1], [0, 0, 1, 1], [], []>} : vector<16x16xbf16>, vector<16x32xbf16>, vector<16x32xf32> -> vector<16x32xf32>
    %55 = vector.broadcast %51 : vector<1x32xf32> to vector<16x32xf32>
    %56 = arith.addf %54, %55 : vector<16x32xf32>
    %57 = vector.shape_cast %53 : vector<16x32xf32> to vector<2x8x32xf32>
    %58 = vector.shape_cast %56 : vector<16x32xf32> to vector<2x8x32xf32>
    %59 = vector.shape_cast %57 : vector<2x8x32xf32> to vector<2x8x1x32xf32>
    %60 = vector.shape_cast %58 : vector<2x8x32xf32> to vector<2x1x8x32xf32>
    %61 = vector.broadcast %59 : vector<2x8x1x32xf32> to vector<2x8x8x32xf32>
    %62 = vector.broadcast %60 : vector<2x1x8x32xf32> to vector<2x8x8x32xf32>
    %63 = arith.addf %61, %62 : vector<2x8x8x32xf32>
    %cst_38 = arith.constant 2.000000e-01 : f32
    %64 = vector.broadcast %cst_38 : f32 to vector<2x8x8x32xf32>
    %65 = arith.mulf %64, %63 : vector<2x8x8x32xf32>
    %66 = arith.maximumf %63, %65 : vector<2x8x8x32xf32>
    %67 = vector.shape_cast %66 : vector<2x8x8x32xf32> to vector<128x32xf32>
    %c0_39 = arith.constant 0 : index
    %c0_40 = arith.constant 0 : index
    %68 = vector.load %arg15[%c0_39, %c0_40] : memref<32x64xbf16, #tpu.memory_space<vmem>>, vector<32x64xbf16>
    %c0_41 = arith.constant 0 : index
    %c0_42 = arith.constant 0 : index
    %69 = vector.load %arg16[%c0_41, %c0_42] : memref<1x64xf32, #tpu.memory_space<vmem>>, vector<1x64xf32>
    %70 = arith.truncf %67 : vector<128x32xf32> to vector<128x32xbf16>
    %cst_43 = arith.constant dense<0.000000e+00> : vector<128x64xf32>
    %71 = tpu.matmul %70, %68, %cst_43 {dimension_numbers = #tpu.dot_dimension_numbers<[1], [0], [0], [1], [0, 0, 1, 1], [], []>} : vector<128x32xbf16>, vector<32x64xbf16>, vector<128x64xf32> -> vector<128x64xf32>
    %72 = vector.broadcast %69 : vector<1x64xf32> to vector<128x64xf32>
    %73 = arith.addf %71, %72 : vector<128x64xf32>
    %cst_44 = arith.constant 2.000000e-01 : f32
    %74 = vector.broadcast %cst_44 : f32 to vector<128x64xf32>
    %75 = arith.mulf %74, %73 : vector<128x64xf32>
    %76 = arith.maximumf %73, %75 : vector<128x64xf32>
    %77 = vector.shape_cast %76 : vector<128x64xf32> to vector<16x8x64xf32>
    %cst_45 = arith.constant dense<0.000000e+00> : vector<16x64xf32>
    %78 = vector.multi_reduction <add>, %77, %cst_45 [1] : vector<16x8x64xf32> to vector<16x64xf32>
    %c0_46 = arith.constant 0 : index
    %c0_47 = arith.constant 0 : index
    %79 = vector.load %arg17[%c0_46, %c0_47] : memref<64x64xbf16, #tpu.memory_space<vmem>>, vector<64x64xbf16>
    %c0_48 = arith.constant 0 : index
    %c0_49 = arith.constant 0 : index
    %80 = vector.load %arg18[%c0_48, %c0_49] : memref<16x64xbf16, #tpu.memory_space<vmem>>, vector<16x64xbf16>
    %c0_50 = arith.constant 0 : index
    %c0_51 = arith.constant 0 : index
    %81 = vector.load %arg19[%c0_50, %c0_51] : memref<1x64xf32, #tpu.memory_space<vmem>>, vector<1x64xf32>
    %82 = arith.truncf %78 : vector<16x64xf32> to vector<16x64xbf16>
    %cst_52 = arith.constant dense<0.000000e+00> : vector<16x64xf32>
    %83 = tpu.matmul %82, %79, %cst_52 {dimension_numbers = #tpu.dot_dimension_numbers<[1], [0], [0], [1], [0, 0, 1, 1], [], []>} : vector<16x64xbf16>, vector<64x64xbf16>, vector<16x64xf32> -> vector<16x64xf32>
    %cst_53 = arith.constant dense<0.000000e+00> : vector<16x64xf32>
    %84 = tpu.matmul %52, %80, %cst_53 {dimension_numbers = #tpu.dot_dimension_numbers<[1], [0], [0], [1], [0, 0, 1, 1], [], []>} : vector<16x16xbf16>, vector<16x64xbf16>, vector<16x64xf32> -> vector<16x64xf32>
    %85 = arith.addf %83, %84 : vector<16x64xf32>
    %86 = vector.broadcast %81 : vector<1x64xf32> to vector<16x64xf32>
    %87 = arith.addf %85, %86 : vector<16x64xf32>
    %cst_54 = arith.constant 2.000000e-01 : f32
    %88 = vector.broadcast %cst_54 : f32 to vector<16x64xf32>
    %89 = arith.mulf %88, %87 : vector<16x64xf32>
    %90 = arith.maximumf %87, %89 : vector<16x64xf32>
    %c0_55 = arith.constant 0 : index
    %c0_56 = arith.constant 0 : index
    %91 = vector.load %arg20[%c0_55, %c0_56] : memref<64x128xbf16, #tpu.memory_space<vmem>>, vector<64x128xbf16>
    %c0_57 = arith.constant 0 : index
    %c0_58 = arith.constant 0 : index
    %92 = vector.load %arg21[%c0_57, %c0_58] : memref<1x128xf32, #tpu.memory_space<vmem>>, vector<1x128xf32>
    %93 = arith.truncf %90 : vector<16x64xf32> to vector<16x64xbf16>
    %cst_59 = arith.constant dense<0.000000e+00> : vector<16x128xf32>
    %94 = tpu.matmul %93, %91, %cst_59 {dimension_numbers = #tpu.dot_dimension_numbers<[1], [0], [0], [1], [0, 0, 1, 1], [], []>} : vector<16x64xbf16>, vector<64x128xbf16>, vector<16x128xf32> -> vector<16x128xf32>
    %95 = vector.broadcast %92 : vector<1x128xf32> to vector<16x128xf32>
    %96 = arith.addf %94, %95 : vector<16x128xf32>
    %c0_60 = arith.constant 0 : index
    %c0_61 = arith.constant 0 : index
    %97 = vector.load %arg22[%c0_60, %c0_61] : memref<16x128xf32, #tpu.memory_space<vmem>>, vector<16x128xf32>
    tpu.vector_store %arg22[%c0_60, %c0_61], %96 {strides = array<i32>} : memref<16x128xf32, #tpu.memory_space<vmem>>, vector<16x128xf32>,
    return
  }
  func.func @transform_0(%arg0: i32) -> (i32, i32) {
    %c0_i32 = arith.constant 0 : i32
    %c0_i32_0 = arith.constant 0 : i32
    return %arg0, %c0_i32 : i32, i32
  }
  func.func @transform_1(%arg0: i32) -> (i32, i32) {
    %c0_i32 = arith.constant 0 : i32
    %c0_i32_0 = arith.constant 0 : i32
    %c0_i32_1 = arith.constant 0 : i32
    return %c0_i32, %c0_i32_0 : i32, i32
  }
  func.func @transform_2(%arg0: i32) -> (i32, i32) {
    %c0_i32 = arith.constant 0 : i32
    %c0_i32_0 = arith.constant 0 : i32
    %c0_i32_1 = arith.constant 0 : i32
    return %c0_i32, %c0_i32_0 : i32, i32
  }
  func.func @transform_3(%arg0: i32) -> (i32, i32) {
    %c0_i32 = arith.constant 0 : i32
    %c0_i32_0 = arith.constant 0 : i32
    %c0_i32_1 = arith.constant 0 : i32
    return %c0_i32, %c0_i32_0 : i32, i32
  }
  func.func @transform_4(%arg0: i32) -> (i32, i32) {
    %c0_i32 = arith.constant 0 : i32
    %c0_i32_0 = arith.constant 0 : i32
    %c0_i32_1 = arith.constant 0 : i32
    return %c0_i32, %c0_i32_0 : i32, i32
  }
  func.func @transform_5(%arg0: i32) -> (i32, i32) {
    %c0_i32 = arith.constant 0 : i32
    %c0_i32_0 = arith.constant 0 : i32
    %c0_i32_1 = arith.constant 0 : i32
    return %c0_i32, %c0_i32_0 : i32, i32
  }
  func.func @transform_6(%arg0: i32) -> (i32, i32) {
    %c0_i32 = arith.constant 0 : i32
    %c0_i32_0 = arith.constant 0 : i32
    %c0_i32_1 = arith.constant 0 : i32
    return %c0_i32, %c0_i32_0 : i32, i32
  }
  func.func @transform_7(%arg0: i32) -> (i32, i32) {
    %c0_i32 = arith.constant 0 : i32
    %c0_i32_0 = arith.constant 0 : i32
    %c0_i32_1 = arith.constant 0 : i32
    return %c0_i32, %c0_i32_0 : i32, i32
  }
  func.func @transform_8(%arg0: i32) -> (i32, i32) {
    %c0_i32 = arith.constant 0 : i32
    %c0_i32_0 = arith.constant 0 : i32
    %c0_i32_1 = arith.constant 0 : i32
    return %c0_i32, %c0_i32_0 : i32, i32
  }
  func.func @transform_9(%arg0: i32) -> (i32, i32) {
    %c0_i32 = arith.constant 0 : i32
    %c0_i32_0 = arith.constant 0 : i32
    %c0_i32_1 = arith.constant 0 : i32
    return %c0_i32, %c0_i32_0 : i32, i32
  }
  func.func @transform_10(%arg0: i32) -> (i32, i32) {
    %c0_i32 = arith.constant 0 : i32
    %c0_i32_0 = arith.constant 0 : i32
    %c0_i32_1 = arith.constant 0 : i32
    return %c0_i32, %c0_i32_0 : i32, i32
  }
  func.func @transform_11(%arg0: i32) -> (i32, i32) {
    %c0_i32 = arith.constant 0 : i32
    %c0_i32_0 = arith.constant 0 : i32
    %c0_i32_1 = arith.constant 0 : i32
    return %c0_i32, %c0_i32_0 : i32, i32
  }
  func.func @transform_12(%arg0: i32) -> (i32, i32) {
    %c0_i32 = arith.constant 0 : i32
    %c0_i32_0 = arith.constant 0 : i32
    %c0_i32_1 = arith.constant 0 : i32
    return %c0_i32, %c0_i32_0 : i32, i32
  }
  func.func @transform_13(%arg0: i32) -> (i32, i32) {
    %c0_i32 = arith.constant 0 : i32
    %c0_i32_0 = arith.constant 0 : i32
    %c0_i32_1 = arith.constant 0 : i32
    return %c0_i32, %c0_i32_0 : i32, i32
  }
  func.func @transform_14(%arg0: i32) -> (i32, i32) {
    %c0_i32 = arith.constant 0 : i32
    %c0_i32_0 = arith.constant 0 : i32
    %c0_i32_1 = arith.constant 0 : i32
    return %c0_i32, %c0_i32_0 : i32, i32
  }
  func.func @transform_15(%arg0: i32) -> (i32, i32) {
    %c0_i32 = arith.constant 0 : i32
    %c0_i32_0 = arith.constant 0 : i32
    %c0_i32_1 = arith.constant 0 : i32
    return %c0_i32, %c0_i32_0 : i32, i32
  }
  func.func @transform_16(%arg0: i32) -> (i32, i32) {
    %c0_i32 = arith.constant 0 : i32
    %c0_i32_0 = arith.constant 0 : i32
    %c0_i32_1 = arith.constant 0 : i32
    return %c0_i32, %c0_i32_0 : i32, i32
  }
  func.func @transform_17(%arg0: i32) -> (i32, i32) {
    %c0_i32 = arith.constant 0 : i32
    %c0_i32_0 = arith.constant 0 : i32
    %c0_i32_1 = arith.constant 0 : i32
    return %c0_i32, %c0_i32_0 : i32, i32
  }
  func.func @transform_18(%arg0: i32) -> (i32, i32) {
    %c0_i32 = arith.constant 0 : i32
    %c0_i32_0 = arith.constant 0 : i32
    %c0_i32_1 = arith.constant 0 : i32
    return %c0_i32, %c0_i32_0 : i32, i32
  }
  func.func @transform_19(%arg0: i32) -> (i32, i32) {
    %c0_i32 = arith.constant 0 : i32
    %c0_i32_0 = arith.constant 0 : i32
    %c0_i32_1 = arith.constant 0 : i32
    return %c0_i32, %c0_i32_0 : i32, i32
  }
  func.func @transform_20(%arg0: i32) -> (i32, i32) {
    %c0_i32 = arith.constant 0 : i32
    %c0_i32_0 = arith.constant 0 : i32
    %c0_i32_1 = arith.constant 0 : i32
    return %c0_i32, %c0_i32_0 : i32, i32
  }
  func.func @transform_21(%arg0: i32) -> (i32, i32) {
    %c0_i32 = arith.constant 0 : i32
    %c0_i32_0 = arith.constant 0 : i32
    return %arg0, %c0_i32 : i32, i32
  }
}

</mosaic_0001>

<bundles_post_ra>
// kernel: tpu_custom_call.1
= control target key start
LH: loop header
LB: loop body
LE: loop exit
PB: predicated region body
PF: predicated region fallthrough
CT: control target
= control target key end

     0   :  { %s4370_s0 = inlined_call_operand.vmem [shape: f32[32,3], index: 0, kind: input, shape index: {}]   ;;  %s4371_s1 = inlined_call_operand.hbm [shape: bf16[3,32], index: 1, kind: input, shape index: {}]   ;;  %s4372_s2 = inlined_call_operand.hbm [shape: bf16[3,32], index: 2, kind: input, shape index: {}]   ;;  %s4373_s3 = inlined_call_operand.vmem [shape: f32[1,32], index: 3, kind: input, shape index: {}]   ;;  %s4374_s4 = inlined_call_operand.hbm [shape: bf16[32,64], index: 4, kind: input, shape index: {}]   ;;  %s4375_s5 = inlined_call_operand.hbm [shape: f32[1,64], index: 5, kind: input, shape index: {}]   ;;  %s4376_s6 = inlined_call_operand.vmem [shape: bf16[64,64], index: 6, kind: input, shape index: {}]   ;;  %s4377_s7 = inlined_call_operand.hbm [shape: bf16[3,64], index: 7, kind: input, shape index: {}]   ;;  %s4378_s8 = inlined_call_operand.hbm [shape: f32[1,64], index: 8, kind: input, shape index: {}]   ;;  %s4379_s9 = inlined_call_operand.vmem [shape: bf16[64,16], index: 9, kind: input, shape index: {}]   ;;  %s4380_s10 = inlined_call_operand.hbm [shape: f32[1,16], index: 10, kind: input, shape index: {}]   ;;  %s4381_s11 = inlined_call_operand.hbm [shape: bf16[16,32], index: 11, kind: input, shape index: {}]   ;;  %s4382_s12 = inlined_call_operand.vmem [shape: bf16[16,32], index: 12, kind: input, shape index: {}]   ;;  %s4383_s13 = inlined_call_operand.hbm [shape: f32[1,32], index: 13, kind: input, shape index: {}]   ;;  %s4384_s14 = inlined_call_operand.vmem [shape: bf16[32,64], index: 14, kind: input, shape index: {}]   ;;  %s4385_s15 = inlined_call_operand.vmem [shape: f32[1,64], index: 15, kind: input, shape index: {}]   ;;  %s4386_s16 = inlined_call_operand.vmem [shape: bf16[64,64], index: 16, kind: input, shape index: {}]   ;;  %s4387_s17 = inlined_call_operand.vmem [shape: bf16[16,64], index: 17, kind: input, shape index: {}]   ;;  %s4388_s18 = inlined_call_operand.vmem [shape: f32[1,64], index: 18, kind: input, shape index: {}]   ;;  %s4389_s19 = inlined_call_operand.vmem [shape: bf16[64,128], index: 19, kind: input, shape index: {}]   ;;  %s4390_s20 = inlined_call_operand.vmem [shape: f32[1,128], index: 20, kind: input, shape index: {}]   ;;  %s4391_s21 = inlined_call_operand.hbm [shape: f32[32,128], index: 21, kind: output, shape index: {}]  }
   0x1   :  { %4413 = sst [smem:[#allocation32_spill]] %s4370_s0 }
   0x2   :  { %4414 = sst [smem:[#allocation33_spill]] %s4371_s1 }
   0x3   :  { %4415 = sst [smem:[#allocation34_spill]] %s4372_s2 }
   0x4   :  { %4416 = sst [smem:[#allocation35_spill]] %s4373_s3 }
   0x5   :  { %4417 = sst [smem:[#allocation36_spill]] %s4374_s4 }
   0x6   :  { %4418 = sst [smem:[#allocation37_spill]] %s4375_s5 }
   0x7   :  { %4419 = sst [smem:[#allocation38_spill]] %s4378_s8 }
   0x8   :  { %4420 = sst [smem:[#allocation39_spill]] %s4381_s11 }
   0x9   :  { %4421 = sst [smem:[#allocation40_spill]] %s4388_s18 }
   0xa   :  { %4422 = sst [smem:[#allocation41_spill]] %s4390_s20 }
   0xb   :  { %4423 = sst [smem:[#allocation42_spill]] %s4391_s21 }
   0xc   :  { %26 = vsyncpa [#allocation3], 0 }
   0xd   :  { %27 = vsyncpa [#allocation6], 0 }
   0xe   :  { %28 = vsyncpa [#allocation9], 0 }
   0xf   :  { %29 = vsyncpa [#allocation12], 0 }
  0x10   :  { %30 = vsyncpa [#allocation15], 0 }
  0x11   :  { %31 = vsyncpa [#allocation4], 0 }
  0x12   :  { %33 = vsyncpa [#allocation4 + $0x1], 0  ;;  %s3676_s2 = smov 0   ;;  %s3678_s25 = smov 0  }
  0x13   :  { %s3680_s26 = smov 0   ;;  %s3682_s27 = smov 0  }
  0x14 LB: > { %4424 = sst [smem:[#allocation24_spill]] %s3534_s2  ;;  %s3697_s3 = sadd.s32 4294967295, %s3546_s27   ;;  %s3546_s27 = sphi %s3682_s27, %s4469_s27   ;;  %s3542_s26 = sphi %s3680_s26, %s4472_s26   ;;  %s3538_s25 = sphi %s3678_s25, %s4471_s25   ;;  %s3534_s2 = sphi %s3676_s2, %s4470_s2  }
  0x15   : > { %4425 = sst [smem:[#allocation25_spill]] %s3538_s25  ;;  %s2783_s28 = sadd.s32 4294967294, %s3546_s27  }
  0x16   : > { %4426 = sst [smem:[#allocation26_spill]] %s3542_s26  ;;  %s3701_s29 = sadd.s32 1, %s3546_s27  }
  0x17   : > { %4427 = sst [smem:[#allocation27_spill]] %s3546_s27  ;;  %s492_s0 = sadd.s32 1, %s3542_s26 }
  0x18   : > { %4428 = sst [smem:[#allocation28_spill]] %s3701_s29  ;;  %s489_s4 = ssub.s32 %s3546_s27, %s3701_s29 }
  0x19   : > { %p502_p0 = scmp.ne.s32.totalorder %s3542_s26, %s3538_s25  ;;  %p490_p1 = scmp.eq.s32.totalorder %s489_s4, 0 }
  0x1a   : > { %p503_p2 = scmp.eq.s32.totalorder %s3697_s3, 1  ;;  %p508_p3 = scmp.ne.s32.totalorder %s3538_s25, %s3534_s2 }
  0x1b   : > { %p509_p4 = scmp.eq.s32.totalorder %s2783_s28, 1  ;;  %p2784_p7 = scmp.ge.s32.totalorder %s3546_s27, 1 }
  0x1c   : > { %s3712_s30 = scalar_select %p490_p1, %s3542_s26, %s492_s0  }
  0x1d   : > { %p3714_p5 = por %p503_p2, %p502_p0  ;;  %p3718_p6 = por %p509_p4, %p508_p3 }
  0x1e   : > { %4429 = sst [smem:[#allocation29_spill]] %s3712_s30  ;;  %p516_p8 = scmp.lt.s32.totalorder %s3546_s27, 3 }
  0x1f   : > { %s4430_s5 = scalar_select %p3714_p5, 1, 0 }
  0x20   : > { %s4432_s22 = scalar_select %p3718_p6, 1, 0 }
  0x21   : > { %4431 = sst [smem:[#allocation30_spill]] %s4430_s5  ;;  %p4405_p9 = scmp.eq.s32.totalorder %s3697_s3, 0 }
  0x22   : > { %4433 = sst [smem:[#allocation31_spill]] %s4432_s22  ;;  %p3725_p10 = pnand %p2784_p7, %p516_p8 }
  0x23   : > { %s3548_s1 = smov [#allocation5]   ;;  %s3549_s28 = smov [#allocation8]  }
  0x24   : > { %s4434_s23 = scalar_select %p3725_p10, 1, 0 }
  0x25   : > { %s540_s24 = sshll.u32 %s3548_s1, 4  ;;  %p3089_p11 = pneg %p3725_p10  ;;  %s541_s24 = int_to_ptr.vmem [resolvable:$true] %s540_s24 }
  0x26   : > { %s567_s0 = sshll.u32 %s3549_s28, 4  ;;  %s3550_s30 = smov [#allocation11]   ;;  %s3737_s0 = int_to_ptr.vmem [resolvable:$true] %s567_s0 }
  0x27   : > { %p3733_p12 = pnand %p4405_p9, %p3089_p11  ;;  %s592_s26 = sshll.u32 %s3550_s30, 4  ;;  %s3739_s26 = int_to_ptr.vmem [resolvable:$true] %s592_s26 }
  0x28   : > { %s4436_s1 = sld [smem:[#allocation34_spill]] }
  0x29   : > { %p3749_p0 = pneg %p3733_p12 }
  0x2e   : > { %s3212_s2 = scalar_lea.hbm %s4436_s1, 32 }
  0x2f   : > { %p3213_p13 = scmp.ne.s32.totalorder %s4436_s1, %s3212_s2  ;;  %p3219_p3 = scmp.lt.u32.totalorder %s3212_s2, %s4436_s1 }
  0x31   : > { %p3215_p1 = pnand %p3749_p0, %p3213_p13 }
  0x33   : > { %p3216_p2 = pneg %p3215_p1 }
  0x35   : > { %p3221_p4 = pnand %p3219_p3, %p3216_p2 }
  0x37   : > { %3224 = shalt.err (!%p3221_p4)
}
  0x38   : > { %s3225_s29 = scalar_lea.vmem %s541_s24, 32  ;;  %p3233_p9 = scmp.lt.s32.totalorder %s541_s24, %s541_s24 }
  0x39   : > { %p3226_p7 = scmp.ne.s32.totalorder %s541_s24, %s3225_s29  ;;  %p3234_p6 = scmp.lt.s32.totalorder %s3225_s29, %s3225_s29 }
  0x3b   : > { %p3228_p8 = pnand %p3226_p7, %p3749_p0  ;;  %p3235_p5 = por %p3234_p6, %p3233_p9 }
  0x3d   : > { %p3229_p11 = pneg %p3228_p8 }
  0x3f   : > { %p3236_p10 = pnand %p3235_p5, %p3229_p11 }
  0x41   : > { %3239 = shalt.err (!%p3236_p10)
}
  0x42   : > { %3095 = dma.hbm_to_vmem [thread:$0]  (!%p3733_p12), %s4436_s1, 32, %s541_s24, [#allocation6]  }
  0x43   : > { %s4438_s22 = sld [smem:[#allocation37_spill]] }
  0x49   : > { %s3240_s30 = scalar_lea.hbm %s4438_s22, 16 }
  0x4a   : > { %p3241_p13 = scmp.ne.s32.totalorder %s4438_s22, %s3240_s30  ;;  %p3247_p5 = scmp.lt.u32.totalorder %s3240_s30, %s4438_s22 }
  0x4c   : > { %p3243_p1 = pnand %p3241_p13, %p3749_p0 }
  0x4e   : > { %p3244_p6 = pneg %p3243_p1 }
  0x50   : > { %p3249_p9 = pnand %p3247_p5, %p3244_p6 }
  0x52   : > { %3252 = shalt.err (!%p3249_p9)
}
  0x53   : > { %s3253_s24 = scalar_lea.vmem %s3737_s0, 16  ;;  %s3260_s20 = scalar_lea.vmem %s3737_s0, 32 }
  0x54   : > { %p3254_p10 = scmp.ne.s32.totalorder %s3737_s0, %s3253_s24  ;;  %p3261_p4 = scmp.lt.s32.totalorder %s3737_s0, %s3737_s0 }
  0x55   : > { %p3262_p7 = scmp.lt.s32.totalorder %s3260_s20, %s3253_s24 }
  0x56   : > { %p3256_p2 = pnand %p3254_p10, %p3749_p0 }
  0x57   : > { %p3263_p8 = por %p3262_p7, %p3261_p4 }
  0x58   : > { %p3257_p3 = pneg %p3256_p2 }
  0x5a   : > { %p3264_p11 = pnand %p3263_p8, %p3257_p3 }
  0x5c   : > { %3267 = shalt.err (!%p3264_p11)
}
  0x5d   : > { %3101 = dma.hbm_to_vmem [thread:$0]  (!%p3733_p12), %s4438_s22, 16, %s3737_s0, [#allocation9]  }
  0x5e   : > { %s4439_s8 = sld [smem:[#allocation38_spill]] }
  0x64   : > { %s3268_s2 = scalar_lea.hbm %s4439_s8, 16 }
  0x65   : > { %p3269_p13 = scmp.ne.s32.totalorder %s4439_s8, %s3268_s2  ;;  %p3275_p5 = scmp.lt.u32.totalorder %s3268_s2, %s4439_s8 }
  0x67   : > { %p3271_p1 = pnand %p3269_p13, %p3749_p0 }
  0x69   : > { %p3272_p6 = pneg %p3271_p1 }
  0x6b   : > { %p3277_p9 = pnand %p3275_p5, %p3272_p6 }
  0x6d   : > { %3280 = shalt.err (!%p3277_p9)
}
  0x6e   : > { %s3281_s0 = scalar_lea.vmem %s3739_s26, 16  ;;  %s3288_s20 = scalar_lea.vmem %s3739_s26, 32 }
  0x6f   : > { %p3282_p10 = scmp.ne.s32.totalorder %s3739_s26, %s3281_s0  ;;  %p3289_p4 = scmp.lt.s32.totalorder %s3739_s26, %s3739_s26 }
  0x70   : > { %p3290_p7 = scmp.lt.s32.totalorder %s3288_s20, %s3281_s0 }
  0x71   : > { %p3284_p2 = pnand %p3282_p10, %p3749_p0 }
  0x72   : > { %p3291_p8 = por %p3290_p7, %p3289_p4 }
  0x73   : > { %p3285_p3 = pneg %p3284_p2 }
  0x75   : > { %p3292_p11 = pnand %p3291_p8, %p3285_p3 }
  0x77   : > { %3295 = shalt.err (!%p3292_p11)
}
  0x78   : > { %3107 = dma.hbm_to_vmem [thread:$0]  (!%p3733_p12), %s4439_s8, 16, %s3739_s26, [#allocation12]  }
  0x79   : > { %s3551_s21 = smov [#allocation14]   ;;  %s3552_s2 = smov [#allocation2]  }
  0x7a   : > { %s616_s27 = sshll.u32 %s3551_s21, 4  ;;  %s529_s5 = sshll.u32 %s3552_s2, 4  ;;  %s617_s27 = int_to_ptr.vmem [resolvable:$true] %s616_s27  ;;  %s530_s5 = int_to_ptr.vmem [resolvable:$true] %s529_s5 }
  0x7b   : > { %s4440_s11 = sld [smem:[#allocation39_spill]] }
  0x81   : > { %s3296_s24 = scalar_lea.hbm %s4440_s11, 128 }
  0x82   : > { %p3297_p13 = scmp.ne.s32.totalorder %s4440_s11, %s3296_s24  ;;  %p3303_p5 = scmp.lt.u32.totalorder %s3296_s24, %s4440_s11 }
  0x84   : > { %p3299_p1 = pnand %p3297_p13, %p3749_p0 }
  0x86   : > { %p3300_p6 = pneg %p3299_p1 }
  0x88   : > { %p3305_p9 = pnand %p3303_p5, %p3300_p6 }
  0x8a   : > { %3308 = shalt.err (!%p3305_p9)
}
  0x8b   : > { %s3309_s26 = scalar_lea.vmem %s617_s27, 128  ;;  %p3317_p4 = scmp.lt.s32.totalorder %s617_s27, %s617_s27 }
  0x8c   : > { %p3310_p10 = scmp.ne.s32.totalorder %s617_s27, %s3309_s26  ;;  %p3318_p7 = scmp.lt.s32.totalorder %s3309_s26, %s3309_s26 }
  0x8e   : > { %p3312_p2 = pnand %p3310_p10, %p3749_p0  ;;  %p3319_p8 = por %p3318_p7, %p3317_p4 }
  0x90   : > { %p3313_p3 = pneg %p3312_p2 }
  0x92   : > { %p3320_p11 = pnand %p3319_p8, %p3313_p3 }
  0x94   : > { %3323 = shalt.err (!%p3320_p11)
}
  0x95   : > { %s4411_s25 = smov 64   ;;  %s4410_s21 = smov 4  }
  0x96   : > { %3113 = dma.hbm_to_vmem [thread:$0]  (!%p3733_p12), %s4440_s11, 128, %s617_s27, [#allocation15], %s4411_s25, %s4411_s25, %s4410_s21  }
  0x97   : > { %s4441_s24 = sld [smem:[#allocation33_spill]] }
  0x9d   : > { %s3324_s0 = scalar_lea.hbm %s4441_s24, 32 }
  0x9e   : > { %p3325_p13 = scmp.ne.s32.totalorder %s4441_s24, %s3324_s0  ;;  %p3331_p5 = scmp.lt.u32.totalorder %s3324_s0, %s4441_s24 }
  0xa0   : > { %p3327_p1 = pnand %p3325_p13, %p3749_p0 }
  0xa2   : > { %p3328_p6 = pneg %p3327_p1 }
  0xa4   : > { %p3333_p9 = pnand %p3331_p5, %p3328_p6 }
  0xa6   : > { %3336 = shalt.err (!%p3333_p9)
}
  0xa7   : > { %s3337_s1 = scalar_lea.vmem %s530_s5, 32  ;;  %p3345_p4 = scmp.lt.s32.totalorder %s530_s5, %s530_s5 }
  0xa8   : > { %p3338_p10 = scmp.ne.s32.totalorder %s530_s5, %s3337_s1  ;;  %p3346_p7 = scmp.lt.s32.totalorder %s3337_s1, %s3337_s1 }
  0xaa   : > { %p3340_p2 = pnand %p3338_p10, %p3749_p0  ;;  %p3347_p8 = por %p3346_p7, %p3345_p4 }
  0xac   : > { %p3341_p3 = pneg %p3340_p2 }
  0xae   : > { %p3348_p11 = pnand %p3347_p8, %p3341_p3 }
  0xb0   : > { %3351 = shalt.err (!%p3348_p11)
}
  0xb1   : > { %3092 = dma.hbm_to_vmem [thread:$0]  (!%p3733_p12), %s4441_s24, 32, %s530_s5, [#allocation3]  }
  0xb2   : > { %s3555_s8 = smov [#allocation7]   ;;  %s3556_s29 = smov [#allocation10]  }
  0xb3   : > { %s553_s30 = sshll.u32 %s3555_s8, 4  ;;  %s581_s0 = sshll.u32 %s3556_s29, 4  ;;  %s554_s30 = int_to_ptr.vmem [resolvable:$true] %s553_s30  ;;  %s582_s0 = int_to_ptr.vmem [resolvable:$true] %s581_s0 }
  0xb4   : > { %s4442_s26 = sld [smem:[#allocation36_spill]] }
  0xba   : > { %s4443_s21 = smov %s4442_s26  ;;  %s3352_s25 = scalar_lea.hbm %s4442_s26, 256 }
  0xbb   : > { %p3353_p13 = scmp.ne.s32.totalorder %s4443_s21, %s3352_s25  ;;  %p3359_p5 = scmp.lt.u32.totalorder %s3352_s25, %s4443_s21 }
  0xbd   : > { %p3355_p1 = pnand %p3353_p13, %p3749_p0 }
  0xbf   : > { %p3356_p6 = pneg %p3355_p1 }
  0xc1   : > { %p3361_p9 = pnand %p3359_p5, %p3356_p6 }
  0xc3   : > { %3364 = shalt.err (!%p3361_p9)
}
  0xc4   : > { %s3365_s5 = scalar_lea.vmem %s554_s30, 256  ;;  %p3373_p4 = scmp.lt.s32.totalorder %s554_s30, %s554_s30 }
  0xc5   : > { %p3366_p10 = scmp.ne.s32.totalorder %s554_s30, %s3365_s5  ;;  %p3374_p7 = scmp.lt.s32.totalorder %s3365_s5, %s3365_s5 }
  0xc7   : > { %p3368_p2 = pnand %p3366_p10, %p3749_p0  ;;  %p3375_p8 = por %p3374_p7, %p3373_p4 }
  0xc9   : > { %p3369_p3 = pneg %p3368_p2 }
  0xcb   : > { %p3376_p11 = pnand %p3375_p8, %p3369_p3 }
  0xcd   : > { %3379 = shalt.err (!%p3376_p11)
}
  0xce   : > { %s4444_s11 = smov 4   ;;  %s4445_s2 = smov 64  }
  0xcf   : > { %3098 = dma.hbm_to_vmem [thread:$0]  (!%p3733_p12), %s4443_s21, 256, %s554_s30, [#allocation6], %s4445_s2, %s4445_s2, %s4444_s11  }
  0xd0   : > { %s3380_s20 = scalar_lea.hbm %s4377_s7, 32 }
  0xd1   : > { %p3381_p13 = scmp.ne.s32.totalorder %s4377_s7, %s3380_s20  ;;  %p3387_p5 = scmp.lt.u32.totalorder %s3380_s20, %s4377_s7 }
  0xd3   : > { %p3383_p1 = pnand %p3381_p13, %p3749_p0 }
  0xd5   : > { %p3384_p6 = pneg %p3383_p1 }
  0xd7   : > { %p3389_p9 = pnand %p3387_p5, %p3384_p6 }
  0xd9   : > { %3392 = shalt.err (!%p3389_p9)
}
  0xda   : > { %s3393_s5 = scalar_lea.vmem %s582_s0, 32  ;;  %p3401_p4 = scmp.lt.s32.totalorder %s582_s0, %s582_s0 }
  0xdb   : > { %p3394_p10 = scmp.ne.s32.totalorder %s582_s0, %s3393_s5  ;;  %p3402_p7 = scmp.lt.s32.totalorder %s3393_s5, %s3393_s5 }
  0xdd   : > { %p3396_p2 = pnand %p3394_p10, %p3749_p0  ;;  %p3403_p8 = por %p3402_p7, %p3401_p4 }
  0xdf   : > { %p3397_p3 = pneg %p3396_p2 }
  0xe1   : > { %p3404_p11 = pnand %p3403_p8, %p3397_p3 }
  0xe3   : > { %3407 = shalt.err (!%p3404_p11)
}
  0xe4   : > { %3104 = dma.hbm_to_vmem [thread:$0]  (!%p3733_p12), %s4377_s7, 32, %s582_s0, [#allocation9]  }
  0xe5   : > { %s3557_s2 = smov [#allocation13]   ;;  %s3558_s25 = smov [#allocation16]  }
  0xe6   : > { %s606_s22 = sshll.u32 %s3557_s2, 4  ;;  %s633_s8 = sshll.u32 %s3558_s25, 4  ;;  %s607_s22 = int_to_ptr.vmem [resolvable:$true] %s606_s22  ;;  %s634_s8 = int_to_ptr.vmem [resolvable:$true] %s633_s8 }
  0xe7   : > { %s3408_s18 = scalar_lea.hbm %s4380_s10, 16 }
  0xe8   : > { %p3409_p13 = scmp.ne.s32.totalorder %s4380_s10, %s3408_s18  ;;  %p3415_p5 = scmp.lt.u32.totalorder %s3408_s18, %s4380_s10 }
  0xea   : > { %p3411_p1 = pnand %p3409_p13, %p3749_p0 }
  0xec   : > { %p3412_p6 = pneg %p3411_p1 }
  0xee   : > { %p3417_p9 = pnand %p3415_p5, %p3412_p6 }
  0xf0   : > { %3420 = shalt.err (!%p3417_p9)
}
  0xf1   : > { %s3421_s0 = scalar_lea.vmem %s607_s22, 16  ;;  %s3428_s30 = scalar_lea.vmem %s607_s22, 32 }
  0xf2   : > { %p3422_p10 = scmp.ne.s32.totalorder %s607_s22, %s3421_s0  ;;  %p3429_p4 = scmp.lt.s32.totalorder %s607_s22, %s607_s22 }
  0xf3   : > { %p3430_p7 = scmp.lt.s32.totalorder %s3428_s30, %s3421_s0 }
  0xf4   : > { %p3424_p2 = pnand %p3422_p10, %p3749_p0 }
  0xf5   : > { %p3431_p8 = por %p3430_p7, %p3429_p4 }
  0xf6   : > { %p3425_p3 = pneg %p3424_p2 }
  0xf8   : > { %p3432_p11 = pnand %p3431_p8, %p3425_p3 }
  0xfa   : > { %3435 = shalt.err (!%p3432_p11)
}
  0xfb   : > { %3110 = dma.hbm_to_vmem [thread:$0]  (!%p3733_p12), %s4380_s10, 16, %s607_s22, [#allocation12]  }
  0xfc   : > { %s3436_s20 = scalar_lea.hbm %s4383_s13, 16 }
  0xfd   : > { %p3437_p13 = scmp.ne.s32.totalorder %s4383_s13, %s3436_s20  ;;  %p3443_p5 = scmp.lt.u32.totalorder %s3436_s20, %s4383_s13 }
  0xff   : > { %p3439_p1 = pnand %p3437_p13, %p3749_p0 }
 0x101   : > { %p3440_p6 = pneg %p3439_p1 }
 0x103   : > { %p3445_p9 = pnand %p3443_p5, %p3440_p6 }
 0x105   : > { %3448 = shalt.err (!%p3445_p9)
}
 0x106   : > { %s3449_s5 = scalar_lea.vmem %s634_s8, 16  ;;  %s3456_s22 = scalar_lea.vmem %s634_s8, 32 }
 0x107   : > { %p3450_p10 = scmp.ne.s32.totalorder %s634_s8, %s3449_s5  ;;  %p3457_p4 = scmp.lt.s32.totalorder %s634_s8, %s634_s8 }
 0x108   : > { %p3458_p7 = scmp.lt.s32.totalorder %s3456_s22, %s3449_s5 }
 0x109   : > { %p3452_p2 = pnand %p3450_p10, %p3749_p0 }
 0x10a   : > { %p3459_p8 = por %p3458_p7, %p3457_p4 }
 0x10b   : > { %p3453_p3 = pneg %p3452_p2 }
 0x10d   : > { %p3460_p11 = pnand %p3459_p8, %p3453_p3 }
 0x10f   : > { %3463 = shalt.err (!%p3460_p11)
}
 0x110   : > { %3116 = dma.hbm_to_vmem [thread:$0]  (!%p3733_p12), %s4383_s13, 16, %s634_s8, [#allocation15]  }
 0x111   : > { %p4446_p13 = scmp.ne.s32.totalorder %s4434_s23, 0 }
 0x112   : > { %p4447_p1 = scmp.eq.s32.totalorder (!%p4446_p13), %s3697_s3, 0 }
 0x113   : > { %676 = sbr.rel (%p4446_p13) target bundleno = 2228 (0x8b4), region = 104 }
 0x11a   : > { %3509 = dma.done.wait (%p4447_p1), [#allocation3], 32   ;;  %p4448_p0 = pmov %p4447_p1 }
 0x11c   : > { %3511 = vsyncadd (%p4448_p0), [#allocation3], 4294967264  ;;  %p4449_p6 = pmov %p4448_p0 }
 0x11d   : > { %p4450_p5 = pmov %p4448_p0 }
 0x11e   : > { %3513 = dma.done.wait (%p4449_p6), [#allocation6], 288  }
 0x11f   : > { %3515 = vsyncadd (%p4450_p5), [#allocation6], 4294967008  ;;  %p4451_p9 = pmov %p4448_p0 }
 0x120   : > { %p4452_p12 = pmov %p4448_p0 }
 0x121   : > { %3517 = dma.done.wait (%p4451_p9), [#allocation9], 48  }
 0x122   : > { %3519 = vsyncadd (%p4452_p12), [#allocation9], 4294967248  ;;  %p4453_p10 = pmov %p4448_p0 }
 0x123   : > { %p4454_p2 = pmov %p4448_p0 }
 0x124   : > { %3521 = dma.done.wait (%p4453_p10), [#allocation12], 32  }
 0x125   : > { %3523 = vsyncadd (%p4454_p2), [#allocation12], 4294967264  ;;  %p4455_p3 = pmov %p4448_p0 }
 0x126   : > { %p4456_p4 = pmov %p4448_p0 }
 0x127   : > { %3525 = dma.done.wait (%p4455_p3), [#allocation15], 144  }
 0x128   : > { %3527 = vsyncadd (%p4456_p4), [#allocation15], 4294967152  ;;  %vm786_vm0 = vcmask 1040384   ;;  %v3559_v0 = vmov 0.0   ;;  %s2806_s23 = sshll.u32 %s3697_s3, 1  ;;  %vm787_vm1 = vcmask 1041408   ;;  %v890_v15 = vlaneseq }
 0x129   : > { %2923 = vmatprep.subr.bf16.mxu0 %v3559_v0  ;;  %2929 = vmatprep.subr.bf16.mxu1 %v3559_v0  ;;  %v3560_v1 = vmov 65535   ;;  %vm3561_vm2 = vmmov 0   ;;  %p769_p7 = scmp.lt.s32.totalorder %s2806_s23, 3  ;;  %v778_v4 = vld [vmem:[#allocation2] sm:$0x3]  ;;  %s4457_s11 = sld [smem:[#allocation32_spill]] }
 0x12a   : > { %v788_v2 = vsel %vm786_vm0, 4294967295, %v3560_v1  ;;  %2925 = vmatprep.mubr.msk.bf16.mxu0 %vm3561_vm2, %v3559_v0  ;;  %2931 = vmatprep.mubr.msk.bf16.mxu1 %vm3561_vm2, %v3559_v0  ;;  %v779_v5 = vld [vmem:[#allocation5] sm:$0x3]  ;;  %vm782_vm3 = vcmask 23552   ;;  %v3189_v11 = vld [vmem:[#allocation7] sm:$0xff]   ;;  %v3190_v12 = vld [vmem:[#allocation7 + $0x8] sm:$0xff]  }
 0x12b   : > { %s4474_s23 = smov (!%p769_p7, %s2806_s23), 3  ;;  %v3956_v3 = vsel %vm787_vm1, %v788_v2, 0  ;;  %v3562_v13 = vmov 1966171168   ;;  %v891_v17 = vshrl.u32 %v890_v15, 7  ;;  %s4458_s20 = sld [smem:[#allocation35_spill]] }
 0x12c   : > { %s2807_s4 = sshll.u32 %s4474_s23, 3  ;;  %v791_v6 = vand.u32 %v3956_v3, %v778_v4  ;;  %v841_v9 = vand.u32 %v3956_v3, %v779_v5  ;;  %v888_v14 = vunpack.c.l.s4 %v3562_v13  ;;  %vm1143_vm4 = vcmask 261120   ;;  %s4459_s28 = sld [smem:[#allocation40_spill]] }
 0x12d   : > { %v3977_v26 = vsub.s32 0, %v891_v17  ;;  %vm1297_vm5 = vcmask 523264   ;;  %vm1512_vm6 = vcmask 1041409   ;;  %vm1514_vm7 = vcmask 1042434   ;;  %s4460_s8 = sld [smem:[#allocation25_spill]]  ;;  %s4462_s26 = sld [smem:[#allocation30_spill]] }
 0x12e   : > { %2924 = vmatpush3.bf16.msra.mxu0 %v791_v6  ;;  %2930 = vmatpush3.bf16.msra.mxu1 %v841_v9  ;;  %v889_v16 = vunpack.c.0.s8 %v888_v14  ;;  %vm1516_vm8 = vcmask 1043459   ;;  %vm1518_vm9 = vcmask 1044484   ;;  %vm1520_vm10 = vcmask 1045509   ;;  %s2870_s27 = sshll.u32 %s3697_s3, 8  ;;  %s4463_s0 = sld [smem:[#allocation42_spill]] }
 0x12f   : > { %s772_s2 = scalar_lea.vmem %s4457_s11, %s2807_s4  ;;  %2935 = vmatprep.subr.bf16.mxu0 %v3189_v11  ;;  %3047 = vmatprep.subr.bf16.mxu1 %v3189_v11  ;;  %vm1522_vm11 = vcmask 1046534   ;;  %vm1524_vm12 = vcmask 1047559   ;;  %vm1710_vm13 = vcmask 130048   ;;  %s3563_s4 = smov [#allocation17]  }
 0x130   : > { %v776_v7 = vld [vmem:[%s772_s2] sm:$0xff]  ;;  %v777_v8 = vld [vmem:[%s772_s2 + $0x8] sm:$0xff]  ;;  %v3971_v18 = vsub.s32 %v889_v16, %v891_v17 }
 0x131   : > { %v3963_v10 = vpack.c.bf16 %v777_v8, %v776_v7  ;;  %v2809_v24 = vld [vmem:[%s4458_s20] ss:$0 sm:$0xff]  ;;  %s4461_s20 = sld [smem:[#allocation41_spill]] }
 0x133   : > { %2926 = vmatmul.mubr.msk.bf16.vlgmr.msra.gmra.mrb[0].mxu0 %vm782_vm3, %v3963_v10  ;;  %2932 = vmatmul.mubr.msk.bf16.vlgmr.msra.gmra.mrb[0].mxu1 %vm782_vm3, %v3963_v10  ;;  %s765_s11 = sand.u32 1, %s4460_s8   ;;  %p4464_p11 = scmp.ne.s32.totalorder %s4462_s26, 0 }
 0x134   : > { %2936 = vmatpush3.bf16.msra.mxu0 %v3189_v11  ;;  %3049 = vmatpush3.bf16.msra.mxu1 %v3189_v11  ;;  %s2805_s2 = sshll.u32 %s765_s11, 4  ;;  %s4327_s30 = scalar_lea.hbm %s4463_s0, %s2870_s27 }
 0x135   : > { %2937 = vmatprep.subr.bf16.mxu0 %v3190_v12  ;;  %3048 = vmatprep.subr.bf16.mxu1 %v3190_v12  ;;  %s767_s18 = scalar_lea.vmem [#allocation17], %s2805_s2  ;;  %s4329_s23 = scalar_lea.sflag [#allocation4], %s765_s11 }
 0x136   : > { %s2633_s1 = sshll.u32 %s767_s18, 4  ;;  %s4322_s1 = int_to_ptr.vmem [resolvable:$true] %s2633_s1 }
 0x137   : > { %s3464_s3 = scalar_lea.vmem %s4322_s1, 256 }
 0x138   : > { %2938 = vmatpush3.bf16.msra.mxu0 %v3190_v12  ;;  %3050 = vmatpush3.bf16.msra.mxu1 %v3190_v12  ;;  %p3465_p8 = scmp.ne.s32.totalorder %s4322_s1, %s3464_s3 }
 0x139   : > { %2955 = vmatprep.subr.bf16.mxu1 %v3559_v0  ;;  %2973 = vmatprep.subr.bf16.mxu0 %v3559_v0 }
 0x13a   : > { %p3466_p13 = pnand %p3465_p8, %p4464_p11 }
 0x13c   : > { %p3467_p1 = pneg %p3466_p13 }
 0x206   : > { %v827_v19 = vpop.f32.mrb[0].mxu0  ;;  %v877_v20 = vpop.f32.mrb[0].mxu1 }
 0x207   : > { %v886_v21 = vcombine.high %v827_v19, %v827_v19  ;;  %v893_v22 = vrot.slane %v827_v19, %v3971_v18  ;;  %v2927_v23 = vpop.f32.mrb[1].mxu0  ;;  %v2933_v25 = vpop.f32.mrb[1].mxu1  ;;  %v3982_v36 = vadd.f32 %v2809_v24, %v877_v20 }
 0x208   : > { %v830_v27 = vpop.f32.mrb[2].mxu0  ;;  %v880_v28 = vpop.f32.mrb[2].mxu1 }
 0x209   : > { %v900_v29 = vrot.slane %v886_v21, %v3971_v18  ;;  %v901_v30 = vcombine.high %v893_v22, %v893_v22  ;;  %v909_v31 = vrot.slane %v893_v22, %v3971_v18  ;;  %v935_v32 = vcombine.high %v830_v27, %v830_v27  ;;  %v2928_v33 = vpop.f32.mrb[3].mxu0  ;;  %v2934_v34 = vpop.f32.mrb[3].mxu1 }
 0x20a   : > { %v942_v35 = vrot.slane %v830_v27, %v3971_v18  ;;  %v3984_v37 = vadd.f32 %v2809_v24, %v880_v28 }
 0x20b   : > { %v902_v38 = vcombine.high %v900_v29, %v900_v29  ;;  %v916_v39 = vrot.slane %v900_v29, %v3971_v18  ;;  %v923_v40 = vrot.slane %v901_v30, %v3971_v18  ;;  %v931_v41 = vcombine.high %v909_v31, %v909_v31 }
 0x20c   : > { %v987_v42 = vrot.slane %v909_v31, %v3977_v26  ;;  %v949_v43 = vrot.slane %v935_v32, %v3971_v18  ;;  %v950_v44 = vcombine.high %v942_v35, %v942_v35  ;;  %v3991_v45 = vrot.slane %v942_v35, %v3971_v18 }
 0x20d   : > { %v930_v46 = vrot.slane %v902_v38, %v3971_v18  ;;  %v932_v47 = vcombine.high %v916_v39, %v916_v39  ;;  %v933_v48 = vcombine.high %v923_v40, %v923_v40  ;;  %v991_v49 = vrot.slane %v923_v40, %v3977_v26 }
 0x20e   : > { %v995_v50 = vrot.slane %v931_v41, %v3977_v26  ;;  %v1003_v51 = vrot.slane %v916_v39, %v3977_v26  ;;  %v951_v52 = vcombine.high %v949_v43, %v949_v43  ;;  %v965_v53 = vrot.slane %v949_v43, %v3971_v18 }
 0x20f   : > { %v934_v54 = vcombine.high %v930_v46, %v930_v46  ;;  %v999_v55 = vrot.slane %v933_v48, %v3977_v26  ;;  %v1007_v56 = vrot.slane %v930_v46, %v3977_v26  ;;  %v1011_v57 = vrot.slane %v932_v47, %v3977_v26 }
 0x210   : > { %v972_v58 = vrot.slane %v950_v44, %v3971_v18  ;;  %v979_v59 = vrot.slane %v951_v52, %v3971_v18  ;;  %v980_v60 = vcombine.high %v3991_v45, %v3991_v45  ;;  %v981_v61 = vcombine.high %v965_v53, %v965_v53 }
 0x211   : > { %v1015_v62 = vrot.slane %v934_v54, %v3977_v26  ;;  %v1019_v63 = vrot.slane %v3991_v45, %v3977_v26  ;;  %v1035_v1 = vrot.slane %v965_v53, %v3977_v26  ;;  %v1064_v2 = vadd.f32 %v987_v42, %v3982_v36  ;;  %v1418_v45 = vld [vmem:[#allocation10] sm:$0x3] }
 0x212   : > { %v982_v4 = vcombine.high %v972_v58, %v972_v58  ;;  %v983_v5 = vcombine.high %v979_v59, %v979_v59  ;;  %v1023_v6 = vrot.slane %v972_v58, %v3977_v26  ;;  %v1027_v7 = vrot.slane %v980_v60, %v3977_v26 }
 0x213   : > { %v1039_v8 = vrot.slane %v979_v59, %v3977_v26  ;;  %v1043_v9 = vrot.slane %v981_v61, %v3977_v26  ;;  %v1065_v11 = vadd.f32 %v991_v49, %v3982_v36  ;;  %v1080_v12 = vmul.f32 0.2, %v1064_v2 }
 0x214   : > { %v1031_v13 = vrot.slane %v982_v4, %v3977_v26  ;;  %v1047_v14 = vrot.slane %v983_v5, %v3977_v26  ;;  %v1066_v15 = vadd.f32 %v995_v50, %v3982_v36  ;;  %v1067_v16 = vadd.f32 %v999_v55, %v3982_v36 }
 0x215   : > { %v1081_v17 = vmul.f32 0.2, %v1065_v11  ;;  %v1096_v19 = vmax.f32 %v1064_v2, %v1080_v12  ;;  %v1068_v20 = vadd.f32 %v1003_v51, %v3982_v36  ;;  %v1069_v21 = vadd.f32 %v1007_v56, %v3982_v36  ;;  %v3194_v12 = vld [vmem:[%s4376_s6 + $0x18] sm:$0xff]  }
 0x216   : > { %v1082_v22 = vmul.f32 0.2, %v1066_v15  ;;  %v1083_v23 = vmul.f32 0.2, %v1067_v16  ;;  %v1076_v24 = vadd.f32 %v1035_v1, %v3984_v37  ;;  %v1077_v25 = vadd.f32 %v1039_v8, %v3984_v37 }
 0x217   : > { %v1097_v27 = vmax.f32 %v1065_v11, %v1081_v17  ;;  %v1084_v28 = vmul.f32 0.2, %v1068_v20  ;;  %v1085_v29 = vmul.f32 0.2, %v1069_v21  ;;  %v1078_v30 = vadd.f32 %v1043_v9, %v3984_v37  ;;  %v3192_v11 = vld [vmem:[%s4376_s6 + $0x8] sm:$0xff]  }
 0x218   : > { %v1098_v31 = vmax.f32 %v1066_v15, %v1082_v22  ;;  %v1099_v32 = vmax.f32 %v1067_v16, %v1083_v23  ;;  %v1092_v33 = vmul.f32 0.2, %v1076_v24  ;;  %v1093_v34 = vmul.f32 0.2, %v1077_v25  ;;  %v4073_v15 = vld [vmem:[#allocation8] ss:$0 sm:$0xff] }
 0x219   : > { %v1117_v35 = vpack.c.bf16 %v1097_v27, %v1096_v19  ;;  %v1100_v38 = vmax.f32 %v1068_v20, %v1084_v28  ;;  %v1101_v39 = vmax.f32 %v1069_v21, %v1085_v29  ;;  %v1079_v40 = vadd.f32 %v1047_v14, %v3984_v37  ;;  %v3196_v14 = vld [vmem:[%s4379_s9 + $0x8] sm:$0xff]  }
 0x21a   : > { %v1118_v41 = vpack.c.bf16 %v1099_v32, %v1098_v31  ;;  %v1108_v42 = vmax.f32 %v1076_v24, %v1092_v33  ;;  %v1109_v43 = vmax.f32 %v1077_v25, %v1093_v34  ;;  %v1094_v44 = vmul.f32 0.2, %v1078_v30 }
 0x21b   : > { %2939 = vmatprep.mubr.msk.bf16.mxu0 %vm1143_vm4, %v1117_v35  ;;  %v1119_v46 = vpack.c.bf16 %v1101_v39, %v1100_v38  ;;  %v1095_v47 = vmul.f32 0.2, %v1079_v40  ;;  %v1070_v48 = vadd.f32 %v1011_v57, %v3982_v36  ;;  %v1071_v49 = vadd.f32 %v1015_v62, %v3982_v36 }
 0x21c   : > { %2940 = vmatmul.mubr.msk.bf16.vlgmr.msra.gmra.mrb[4].mxu0 %vm1143_vm4, %v1118_v41  ;;  %v1123_v50 = vpack.c.bf16 %v1109_v43, %v1108_v42  ;;  %v1110_v51 = vmax.f32 %v1078_v30, %v1094_v44  ;;  %v1072_v52 = vadd.f32 %v1019_v63, %v3984_v37  ;;  %v1073_v53 = vadd.f32 %v1023_v6, %v3984_v37 }
 0x21d   : > { %2943 = vmatprep.mubr.msk.bf16.mxu0 %vm1143_vm4, %v1119_v46  ;;  %v1111_v54 = vmax.f32 %v1079_v40, %v1095_v47  ;;  %v1086_v55 = vmul.f32 0.2, %v1070_v48  ;;  %v1087_v56 = vmul.f32 0.2, %v1071_v49  ;;  %v1074_v58 = vadd.f32 %v1027_v7, %v3984_v37 }
 0x21e   : > { %v1437_v59 = vand.u32 %v1418_v45, %v3956_v3  ;;  %2951 = vmatprep.mubr.msk.bf16.mxu1 %vm1143_vm4, %v1123_v50  ;;  %v1088_v36 = vmul.f32 0.2, %v1072_v52  ;;  %v1089_v57 = vmul.f32 0.2, %v1073_v53  ;;  %v1075_v60 = vadd.f32 %v1031_v13, %v3984_v37  ;;  %v3191_v37 = vld [vmem:[%s4376_s6] sm:$0xff]  }
 0x21f   : > { %v1124_v61 = vpack.c.bf16 %v1111_v54, %v1110_v51  ;;  %v1102_v62 = vmax.f32 %v1070_v48, %v1086_v55  ;;  %v1103_v63 = vmax.f32 %v1071_v49, %v1087_v56  ;;  %v1090_v1 = vmul.f32 0.2, %v1074_v58  ;;  %v3195_v13 = vld [vmem:[%s4379_s9] sm:$0xff]  }
 0x220   : > { %v1104_v2 = vmax.f32 %v1072_v52, %v1088_v36  ;;  %v1105_v4 = vmax.f32 %v1073_v53, %v1089_v57  ;;  %v1091_v5 = vmul.f32 0.2, %v1075_v60  ;;  %2974 = vmatpush3.bf16.msra.mxu0 %v3195_v13 }
 0x221   : > { %2952 = vmatmul.mubr.msk.bf16.vlgmr.msra.gmra.mrb[4].mxu1 %vm1143_vm4, %v1124_v61  ;;  %v1120_v6 = vpack.c.bf16 %v1103_v63, %v1102_v62  ;;  %v1106_v7 = vmax.f32 %v1074_v58, %v1090_v1  ;;  %2975 = vmatprep.subr.bf16.mxu0 %v3559_v0 }
 0x222   : > { %v1121_v8 = vpack.c.bf16 %v1105_v4, %v1104_v2  ;;  %v1107_v9 = vmax.f32 %v1075_v60, %v1091_v5  ;;  %2956 = vmatpush3.bf16.msra.mxu1 %v1437_v59  ;;  %2957 = vmatprep.mubr.msk.bf16.mxu1 %vm3561_vm2, %v3559_v0 }
 0x223   : > { %2961 = vmatprep.subr.bf16.mxu1 %v3559_v0 }
 0x224   : > { %2944 = vmatmul.mubr.msk.bf16.gmra.mrb[8].mxu0 %vm1143_vm4, %v1120_v6  ;;  %v1122_v3 = vpack.c.bf16 %v1107_v9, %v1106_v7 }
 0x225   : > { %2947 = vmatprep.mubr.msk.bf16.mxu0 %vm1143_vm4, %v1121_v8  ;;  %2976 = vmatpush3.bf16.msra.mxu0 %v3196_v14 }
 0x226   : > { %2977 = vmatprep.subr.bf16.mxu0 %v3559_v0 }
 0x229   : > { %2958 = vmatmul.mubr.msk.bf16.vlgmr.msra.gmra.mrb[8].mxu1 %vm782_vm3, %v3963_v10  ;;  %v3193_v10 = vld [vmem:[%s4376_s6 + $0x10] sm:$0xff]  }
 0x22a   : > { %2969 = vmatprep.mubr.msk.bf16.mxu1 %vm3561_vm2, %v3559_v0  ;;  %2962 = vmatpush3.bf16.msra.mxu1 %v3191_v37 }
 0x22b   : > { %2963 = vmatprep.subr.bf16.mxu1 %v3559_v0 }
 0x22c   : > { %2948 = vmatmul.mubr.msk.bf16.gmra.mrb[12].mxu0 %vm1143_vm4, %v1122_v3 }
 0x22d   : > { %2981 = vmatprep.mubr.msk.bf16.mxu0 %vm3561_vm2, %v3559_v0 }
 0x22e   : > { %2964 = vmatpush3.bf16.msra.mxu1 %v3192_v11 }
 0x22f   : > { %2965 = vmatprep.subr.bf16.mxu1 %v3559_v0 }
 0x232   : > { %2966 = vmatpush3.bf16.msra.mxu1 %v3193_v10 }
 0x233   : > { %2967 = vmatprep.subr.bf16.mxu1 %v3559_v0 }
 0x236   : > { %2968 = vmatpush3.bf16.msra.mxu1 %v3194_v12 }
 0x237   : > { %2985 = vmatprep.subr.bf16.mxu1 %v3559_v0 }
 0x2ef   : > { %v2941_v16 = vpop.f32.mrb[4].mxu0 }
 0x2f0   : > { %v1211_v17 = vadd.f32 %v2941_v16, %v4073_v15  ;;  %v1202_v19 = vpop.f32.mrb[5].mxu0 }
 0x2f1   : > { %v1203_v20 = vadd.f32 %v4073_v15, %v1202_v19  ;;  %v2942_v21 = vpop.f32.mrb[6].mxu0 }
 0x2f2   : > { %v1267_v22 = vmul.f32 0.2, %v1211_v17  ;;  %v1214_v23 = vadd.f32 %v2942_v21, %v4073_v15  ;;  %v1205_v24 = vpop.f32.mrb[7].mxu0 }
 0x2f3   : > { %v1265_v25 = vmul.f32 0.2, %v1203_v20  ;;  %v1206_v27 = vadd.f32 %v4073_v15, %v1205_v24 }
 0x2f4   : > { %v1283_v28 = vmax.f32 %v1211_v17, %v1267_v22  ;;  %v1268_v29 = vmul.f32 0.2, %v1214_v23  ;;  %v2953_v30 = vpop.f32.mrb[4].mxu1 }
 0x2f5   : > { %v1281_v31 = vmax.f32 %v1203_v20, %v1265_v25  ;;  %v1266_v32 = vmul.f32 0.2, %v1206_v27  ;;  %v1250_v33 = vpop.f32.mrb[5].mxu1  ;;  %v1259_v46 = vadd.f32 %v2953_v30, %v4073_v15 }
 0x2f6   : > { %v1312_v34 = vsel %vm1297_vm5, %v1283_v28, 0.0  ;;  %v1284_v35 = vmax.f32 %v1214_v23, %v1268_v29  ;;  %v2954_v38 = vpop.f32.mrb[6].mxu1  ;;  %v1251_v54 = vadd.f32 %v4073_v15, %v1250_v33 }
 0x2f7   : > { %v1313_v39 = vrot.slane %v1312_v34, 4  ;;  %v1298_v40 = vsel %vm1297_vm5, %v1281_v31, 0.0  ;;  %v1282_v41 = vmax.f32 %v1206_v27, %v1266_v32  ;;  %v1253_v42 = vpop.f32.mrb[7].mxu1  ;;  %v2945_v43 = vpop.f32.mrb[8].mxu0  ;;  %v1279_v57 = vmul.f32 0.2, %v1259_v46 }
 0x2f8   : > { %v1299_v44 = vrot.slane %v1298_v40, 4  ;;  %v1319_v45 = vsel %vm1297_vm5, %v1284_v35, 0.0  ;;  %v1218_v47 = vpop.f32.mrb[9].mxu0  ;;  %v1277_v4 = vmul.f32 0.2, %v1251_v54  ;;  %v1262_v7 = vadd.f32 %v2954_v38, %v4073_v15 }
 0x2f9   : > { %v1314_v48 = vadd.f32 %v1313_v39, %v1312_v34  ;;  %v1320_v49 = vrot.slane %v1319_v45, 4  ;;  %v1305_v50 = vsel %vm1297_vm5, %v1282_v41, 0.0  ;;  %v2946_v51 = vpop.f32.mrb[10].mxu0  ;;  %v1295_v10 = vmax.f32 %v1259_v46, %v1279_v57 }
 0x2fa   : > { %v1300_v52 = vadd.f32 %v1299_v44, %v1298_v40  ;;  %v1306_v53 = vrot.slane %v1305_v50, 4  ;;  %v4085_v55 = vpop.f32.mrb[11].mxu0  ;;  %v1254_v12 = vadd.f32 %v4073_v15, %v1253_v42  ;;  %v1293_v21 = vmax.f32 %v1251_v54, %v1277_v4 }
 0x2fb   : > { %v1315_v56 = vrot.slane %v1314_v48, 2  ;;  %v1321_v58 = vadd.f32 %v1320_v49, %v1319_v45  ;;  %v1280_v24 = vmul.f32 0.2, %v1262_v7  ;;  %v1396_v28 = vsel %vm1297_vm5, %v1295_v10, 0.0 }
 0x2fc   : > { %v1301_v59 = vrot.slane %v1300_v52, 2  ;;  %v1307_v36 = vadd.f32 %v1306_v53, %v1305_v50  ;;  %v4087_v60 = vpop.f32.mrb[8].mxu1  ;;  %v1278_v29 = vmul.f32 0.2, %v1254_v12  ;;  %v1382_v33 = vsel %vm1297_vm5, %v1293_v21, 0.0 }
 0x2fd   : > { %v1316_v61 = vadd.f32 %v1315_v56, %v1314_v48  ;;  %v1322_v62 = vrot.slane %v1321_v58, 2  ;;  %v2959_v63 = vpop.f32.mrb[9].mxu1  ;;  %v1397_v34 = vrot.slane %v1396_v28, 4  ;;  %v1296_v35 = vmax.f32 %v1262_v7, %v1280_v24 }
 0x2fe   : > { %v1302_v1 = vadd.f32 %v1301_v59, %v1300_v52  ;;  %v1308_v2 = vrot.slane %v1307_v36, 2  ;;  %v4089_v5 = vpop.f32.mrb[10].mxu1  ;;  %v1227_v38 = vadd.f32 %v2945_v43, %v4073_v15  ;;  %v1294_v41 = vmax.f32 %v1254_v12, %v1278_v29 }
 0x2ff   : > { %v1317_v6 = vrot.slane %v1316_v61, 1  ;;  %v1323_v8 = vadd.f32 %v1322_v62, %v1321_v58  ;;  %v2949_v9 = vpop.f32.mrb[12].mxu0  ;;  %v2960_v3 = vpop.f32.mrb[11].mxu1  ;;  %v1219_v42 = vadd.f32 %v4073_v15, %v1218_v47  ;;  %v1383_v45 = vrot.slane %v1382_v33, 4 }
 0x300   : > { %v1303_v37 = vrot.slane %v1302_v1, 1  ;;  %v1309_v11 = vadd.f32 %v1308_v2, %v1307_v36  ;;  %v1234_v13 = vpop.f32.mrb[13].mxu0  ;;  %v1271_v46 = vmul.f32 0.2, %v1227_v38  ;;  %v1230_v48 = vadd.f32 %v2946_v51, %v4073_v15 }
 0x301   : > { %v1318_v14 = vadd.f32 %v1317_v6, %v1316_v61  ;;  %v1324_v16 = vrot.slane %v1323_v8, 1  ;;  %v2950_v17 = vpop.f32.mrb[14].mxu0  ;;  %v1269_v52 = vmul.f32 0.2, %v1219_v42  ;;  %v4102_v54 = vadd.f32 %v1397_v34, %v1396_v28 }
 0x302   : > { %v1304_v19 = vadd.f32 %v1303_v37, %v1302_v1  ;;  %v1310_v20 = vrot.slane %v1309_v11, 1  ;;  %v4093_v22 = vpop.f32.mrb[15].mxu0  ;;  %v1403_v43 = vsel %vm1297_vm5, %v1296_v35, 0.0  ;;  %v1287_v56 = vmax.f32 %v1227_v38, %v1271_v46 }
 0x303   : > { %v1325_v23 = vadd.f32 %v1324_v16, %v1323_v8  ;;  %v1422_v30 = vpack.c.bf16 %v1318_v14, %v1318_v14  ;;  %v1389_v58 = vsel %vm1297_vm5, %v1294_v41, 0.0  ;;  %v1285_v59 = vmax.f32 %v1219_v42, %v1269_v52 }
 0x304   : > { %v1420_v25 = vpack.c.bf16 %v1304_v19, %v1304_v19  ;;  %v1311_v27 = vadd.f32 %v1310_v20, %v1309_v11  ;;  %v1272_v36 = vmul.f32 0.2, %v1230_v48  ;;  %v4109_v57 = vadd.f32 %v1383_v45, %v1382_v33 }
 0x305   : > { %v1423_v31 = vpack.c.bf16 %v1325_v23, %v1325_v23  ;;  %v1498_v44 = vunpack.c.l.b16 %v1422_v30  ;;  %v1340_v51 = vsel %vm1297_vm5, %v1287_v56, 0.0  ;;  %v1222_v61 = vadd.f32 %v4073_v15, %v4085_v55 }
 0x306   : > { %v1421_v32 = vpack.c.bf16 %v1311_v27, %v1311_v27  ;;  %v1496_v39 = vunpack.c.l.b16 %v1420_v25  ;;  %v1243_v62 = vadd.f32 %v2949_v9, %v4073_v15  ;;  %v1404_v63 = vrot.slane %v1403_v43, 4 }
 0x307   : > { %v1499_v49 = vunpack.c.l.b16 %v1423_v31  ;;  %v1341_v1 = vrot.slane %v1340_v51, 4  ;;  %v1326_v2 = vsel %vm1297_vm5, %v1285_v59, 0.0  ;;  %v1288_v4 = vmax.f32 %v1230_v48, %v1272_v36 }
 0x308   : > { %v1497_v40 = vunpack.c.l.b16 %v1421_v32  ;;  %v1390_v6 = vrot.slane %v1389_v58, 4  ;;  %v1327_v8 = vrot.slane %v1326_v2, 4  ;;  %v1270_v7 = vmul.f32 0.2, %v1222_v61 }
 0x309   : > { %v1275_v3 = vmul.f32 0.2, %v1243_v62  ;;  %v1342_v37 = vadd.f32 %v1341_v1, %v1340_v51  ;;  %v1347_v11 = vsel %vm1297_vm5, %v1288_v4, 0.0  ;;  %v1235_v10 = vadd.f32 %v4073_v15, %v1234_v13 }
 0x30a   : > { %v1513_v50 = vsel %vm1512_vm6, %v1497_v40, %v1496_v39  ;;  %v1246_v12 = vadd.f32 %v2950_v17, %v4073_v15  ;;  %v1385_v55 = vrot.slane %v4109_v57, 2  ;;  %v1328_v14 = vadd.f32 %v1327_v8, %v1326_v2 }
 0x30b   : > { %v1515_v53 = vsel %vm1514_vm7, %v1498_v44, %v1513_v50  ;;  %v1348_v9 = vrot.slane %v1347_v11, 4  ;;  %v1286_v16 = vmax.f32 %v1222_v61, %v1270_v7  ;;  %v1343_v19 = vrot.slane %v1342_v37, 2 }
 0x30c   : > { %v4107_v47 = vsel %vm1516_vm8, %v1499_v49, %v1515_v53  ;;  %v1291_v20 = vmax.f32 %v1243_v62, %v1275_v3  ;;  %v1273_v21 = vmul.f32 0.2, %v1235_v10  ;;  %v1276_v23 = vmul.f32 0.2, %v1246_v12 }
 0x30d   : > { %v1391_v24 = vadd.f32 %v1390_v6, %v1389_v58  ;;  %v1329_v25 = vrot.slane %v1328_v14, 2  ;;  %v1349_v27 = vadd.f32 %v1348_v9, %v1347_v11  ;;  %v1333_v28 = vsel %vm1297_vm5, %v1286_v16, 0.0 }
 0x30e   : > { %v1344_v29 = vadd.f32 %v1343_v19, %v1342_v37  ;;  %v1334_v30 = vrot.slane %v1333_v28, 4  ;;  %v1368_v13 = vsel %vm1297_vm5, %v1291_v20, 0.0  ;;  %v1289_v17 = vmax.f32 %v1235_v10, %v1273_v21 }
 0x30f   : > { %v1330_v31 = vadd.f32 %v1329_v25, %v1328_v14  ;;  %v1350_v32 = vrot.slane %v1349_v27, 2  ;;  %v1369_v33 = vrot.slane %v1368_v13, 4  ;;  %v1292_v34 = vmax.f32 %v1246_v12, %v1276_v23 }
 0x310   : > { %v1345_v35 = vrot.slane %v1344_v29, 1  ;;  %v1335_v38 = vadd.f32 %v1334_v30, %v1333_v28  ;;  %v1354_v39 = vsel %vm1297_vm5, %v1289_v17, 0.0  ;;  %v1238_v40 = vadd.f32 %v4073_v15, %v4093_v22 }
 0x311   : > { %v1331_v41 = vrot.slane %v1330_v31, 1  ;;  %v1351_v42 = vadd.f32 %v1350_v32, %v1349_v27  ;;  %v1370_v44 = vadd.f32 %v1369_v33, %v1368_v13  ;;  %v1355_v45 = vrot.slane %v1354_v39, 4 }
 0x312   : > { %v1405_v46 = vadd.f32 %v1404_v63, %v1403_v43  ;;  %v1336_v48 = vrot.slane %v1335_v38, 2  ;;  %v1375_v49 = vsel %vm1297_vm5, %v1292_v34, 0.0  ;;  %v1274_v50 = vmul.f32 0.2, %v1238_v40 }
 0x313   : > { %v1332_v52 = vadd.f32 %v1331_v41, %v1330_v31  ;;  %v1352_v53 = vrot.slane %v1351_v42, 1  ;;  %v1371_v56 = vrot.slane %v1370_v44, 2  ;;  %v1356_v58 = vadd.f32 %v1355_v45, %v1354_v39 }
 0x314   : > { %v1392_v59 = vrot.slane %v1391_v24, 2  ;;  %v1337_v36 = vadd.f32 %v1336_v48, %v1335_v38  ;;  %v1376_v51 = vrot.slane %v1375_v49, 4  ;;  %v1290_v61 = vmax.f32 %v1238_v40, %v1274_v50 }
 0x315   : > { %v1346_v62 = vadd.f32 %v1345_v35, %v1344_v29  ;;  %v1424_v1 = vpack.c.bf16 %v1332_v52, %v1332_v52  ;;  %v1353_v15 = vadd.f32 %v1352_v53, %v1351_v42  ;;  %v1357_v22 = vrot.slane %v1356_v58, 2 }
 0x316   : > { %v1399_v2 = vrot.slane %v4102_v54, 2  ;;  %v1338_v4 = vrot.slane %v1337_v36, 1  ;;  %v1377_v43 = vadd.f32 %v1376_v51, %v1375_v49  ;;  %v1361_v63 = vsel %vm1297_vm5, %v1290_v61, 0.0 }
 0x317   : > { %v1386_v6 = vadd.f32 %v1385_v55, %v4109_v57  ;;  %v1500_v8 = vunpack.c.l.b16 %v1424_v1  ;;  %v1372_v7 = vadd.f32 %v1371_v56, %v1370_v44  ;;  %v1358_v3 = vadd.f32 %v1357_v22, %v1356_v58 }
 0x318   : > { %v1406_v37 = vrot.slane %v1405_v46, 2  ;;  %v1339_v11 = vadd.f32 %v1338_v4, %v1337_v36  ;;  %v1378_v10 = vrot.slane %v1377_v43, 2  ;;  %v1362_v12 = vrot.slane %v1361_v63, 4 }
 0x319   : > { %v1393_v14 = vadd.f32 %v1392_v59, %v1391_v24  ;;  %v1426_v9 = vpack.c.bf16 %v1346_v62, %v1346_v62  ;;  %v1519_v16 = vsel %vm1518_vm9, %v1500_v8, %v4107_v47  ;;  %v1427_v19 = vpack.c.bf16 %v1353_v15, %v1353_v15 }
 0x31a   : > { %v1425_v20 = vpack.c.bf16 %v1339_v11, %v1339_v11  ;;  %v1359_v21 = vrot.slane %v1358_v3, 1  ;;  %v1379_v23 = vadd.f32 %v1378_v10, %v1377_v43  ;;  %v1363_v25 = vadd.f32 %v1362_v12, %v1361_v63  ;;  %v3197_v10 = vld [vmem:[%s4379_s9 + $0x10] sm:$0xff]   ;;  %v3198_v12 = vld [vmem:[%s4379_s9 + $0x18] sm:$0xff]  }
 0x31b   : > { %v1400_v27 = vadd.f32 %v1399_v2, %v4102_v54  ;;  %v1373_v57 = vrot.slane %v1372_v7, 1  ;;  %v1407_v55 = vadd.f32 %v1406_v37, %v1405_v46  ;;  %v1387_v13 = vrot.slane %v1386_v6, 1  ;;  %2978 = vmatpush3.bf16.msra.mxu0 %v3197_v10 }
 0x31c   : > { %v1501_v28 = vunpack.c.l.b16 %v1425_v20  ;;  %v1380_v29 = vrot.slane %v1379_v23, 1  ;;  %v1364_v30 = vrot.slane %v1363_v25, 2  ;;  %v1394_v24 = vrot.slane %v1393_v14, 1  ;;  %2979 = vmatprep.subr.bf16.mxu0 %v3559_v0 }
 0x31d   : > { %v1502_v17 = vunpack.c.l.b16 %v1426_v9  ;;  %v1503_v31 = vunpack.c.l.b16 %v1427_v19  ;;  %v1360_v32 = vadd.f32 %v1359_v21, %v1358_v3  ;;  %v1401_v34 = vrot.slane %v1400_v27, 1  ;;  %v2828_v9 = vld [vmem:[#allocation11] ss:$0 sm:$0xff] }
 0x31e   : > { %v1521_v47 = vsel %vm1520_vm10, %v1501_v28, %v1519_v16  ;;  %v1365_v33 = vadd.f32 %v1364_v30, %v1363_v25  ;;  %v1374_v35 = vadd.f32 %v1373_v57, %v1372_v7  ;;  %v1408_v38 = vrot.slane %v1407_v55, 1 }
 0x31f   : > { %v1523_v54 = vsel %vm1522_vm11, %v1502_v17, %v1521_v47  ;;  %v1381_v39 = vadd.f32 %v1380_v29, %v1379_v23  ;;  %v1388_v42 = vadd.f32 %v1387_v13, %v1386_v6  ;;  %v1395_v44 = vadd.f32 %v1394_v24, %v1393_v14  ;;  %2980 = vmatpush3.bf16.msra.mxu0 %v3198_v12  ;;  %v3199_v14 = vld [vmem:[#allocation14] sm:$0xff]   ;;  %v2829_v24 = vld [vmem:[#allocation13] ss:$0 sm:$0xff] }
 0x320   : > { %v1366_v40 = vrot.slane %v1365_v33, 1  ;;  %v1525_v41 = vsel %vm1524_vm12, %v1503_v31, %v1523_v54  ;;  %v1428_v45 = vpack.c.bf16 %v1360_v32, %v1360_v32  ;;  %v1402_v48 = vadd.f32 %v1401_v34, %v1400_v27  ;;  %v3202_v54 = vld [vmem:[%s4384_s14] sm:$0xff]  }
 0x321   : > { %v1430_v49 = vpack.c.bf16 %v1374_v35, %v1374_v35  ;;  %v1409_v50 = vadd.f32 %v1408_v38, %v1407_v55  ;;  %v1431_v52 = vpack.c.bf16 %v1381_v39, %v1381_v39  ;;  %v1432_v56 = vpack.c.bf16 %v1388_v42, %v1388_v42  ;;  %v3201_v35 = vld [vmem:[%s4387_s17] sm:$0xff]   ;;  %v3203_v38 = vld [vmem:[%s4384_s14 + $0x8] sm:$0xff]   ;;  %2997 = vmatprep.subr.bf16.mxu0 %v3202_v54 }
 0x322   : > { %v1367_v46 = vadd.f32 %v1366_v40, %v1365_v33  ;;  %v1433_v58 = vpack.c.bf16 %v1395_v44, %v1395_v44  ;;  %v1504_v59 = vunpack.c.l.b16 %v1428_v45  ;;  %v1434_v51 = vpack.c.bf16 %v1402_v48, %v1402_v48 }
 0x323   : > { %v1506_v61 = vunpack.c.l.b16 %v1430_v49  ;;  %v1435_v62 = vpack.c.bf16 %v1409_v50, %v1409_v50  ;;  %v1507_v1 = vunpack.c.l.b16 %v1431_v52  ;;  %v1508_v22 = vunpack.c.l.b16 %v1432_v56 }
 0x324   : > { %v1429_v53 = vpack.c.bf16 %v1367_v46, %v1367_v46  ;;  %v1509_v4 = vunpack.c.l.b16 %v1433_v58  ;;  %v1510_v63 = vunpack.c.l.b16 %v1434_v51 }
 0x325   : > { %v1511_v8 = vunpack.c.l.b16 %v1435_v62 }
 0x326   : > { %v1505_v36 = vunpack.c.l.b16 %v1429_v53 }
 0x328   : > { %v1526_v15 = vsel %vm1512_vm6, %v1505_v36, %v1504_v59 }
 0x329   : > { %v1527_v2 = vsel %vm1514_vm7, %v1506_v61, %v1526_v15 }
 0x32a   : > { %v1528_v43 = vsel %vm1516_vm8, %v1507_v1, %v1527_v2 }
 0x32b   : > { %v1529_v6 = vsel %vm1518_vm9, %v1508_v22, %v1528_v43 }
 0x32c   : > { %v1530_v7 = vsel %vm1520_vm10, %v1509_v4, %v1529_v6 }
 0x32d   : > { %v1531_v3 = vsel %vm1522_vm11, %v1510_v63, %v1530_v7 }
 0x32e   : > { %v1532_v37 = vsel %vm1524_vm12, %v1511_v8, %v1531_v3  ;;  %v2837_v8 = vld [vmem:[#allocation16] ss:$0 sm:$0xff] }
 0x32f   : > { %v1533_v11 = vpack.c.b16 %v1532_v37, %v1525_v41 }
 0x331   : > { %2970 = vmatmul.mubr.msk.bf16.vlgmr.msra.gmra.mrb[12].mxu1 %vm1297_vm5, %v1533_v11 }
 0x332   : > { %2987 = vmatprep.mubr.msk.bf16.mxu1 %vm3561_vm2, %v3559_v0  ;;  %2986 = vmatpush3.bf16.msra.mxu1 %v3199_v14 }
 0x333   : > { %2991 = vmatprep.subr.bf16.mxu1 %v3559_v0 }
 0x404   : > { %v1595_v16 = vpop.f32.mrb[12].mxu1 }
 0x405   : > { %v1596_v19 = vadd.f32 %v1595_v16, %v4087_v60  ;;  %v2971_v20 = vpop.f32.mrb[13].mxu1 }
 0x406   : > { %v1598_v21 = vpop.f32.mrb[14].mxu1 }
 0x407   : > { %v1608_v23 = vadd.f32 %v2828_v9, %v1596_v19  ;;  %v1599_v25 = vadd.f32 %v1598_v21, %v4089_v5  ;;  %v2972_v27 = vpop.f32.mrb[15].mxu1  ;;  %v3200_v5 = vld [vmem:[%s4382_s12] sm:$0xff]  }
 0x409   : > { %v1610_v57 = vmul.f32 0.2, %v1608_v23  ;;  %v1609_v55 = vadd.f32 %v2828_v9, %v1599_v25 }
 0x40b   : > { %v1611_v28 = vmul.f32 0.2, %v1609_v55  ;;  %v1612_v29 = vmax.f32 %v1608_v23, %v1610_v57 }
 0x40d   : > { %v1613_v30 = vmax.f32 %v1609_v55, %v1611_v28 }
 0x40f   : > { %v1623_v13 = vpack.c.bf16 %v1613_v30, %v1612_v29 }
 0x411   : > { %2982 = vmatmul.mubr.msk.bf16.vlgmr.msra.gmra.mrb[16].mxu0 %vm1297_vm5, %v1623_v13 }
 0x412   : > { %2998 = vmatpush3.bf16.msra.mxu0 %v3202_v54 }
 0x413   : > { %2999 = vmatprep.subr.bf16.mxu0 %v3203_v38 }
 0x416   : > { %3000 = vmatpush3.bf16.msra.mxu0 %v3203_v38 }
 0x417   : > { %3035 = vmatprep.subr.bf16.mxu0 %v3559_v0 }
 0x4e4   : > { %v1691_v17 = vpop.f32.mrb[16].mxu0 }
 0x4e5   : > { %v2983_v31 = vpop.f32.mrb[17].mxu0  ;;  %v1692_v32 = vadd.f32 %v2829_v24, %v1691_v17 }
 0x4e6   : > { %v1694_v47 = vpop.f32.mrb[18].mxu0 }
 0x4e7   : > { %v1695_v60 = vadd.f32 %v2829_v24, %v1694_v47  ;;  %v2984_v33 = vpop.f32.mrb[19].mxu0 }
 0x4e9   : > { %v1703_v34 = vpack.c.bf16 %v1695_v60, %v1692_v32 }
 0x4eb   : > { %2988 = vmatmul.mubr.msk.bf16.vlgmr.msra.gmra.mrb[16].mxu1 %vm1710_vm13, %v1703_v34 }
 0x4ec   : > { %2992 = vmatpush3.bf16.msra.mxu1 %v3200_v5  ;;  %2993 = vmatprep.mubr.msk.bf16.mxu1 %vm3561_vm2, %v3559_v0 }
 0x4ed   : > { %3017 = vmatprep.subr.bf16.mxu1 %v3559_v0 }
 0x4f3   : > { %2994 = vmatmul.mubr.msk.bf16.vlgmr.msra.gmra.mrb[20].mxu1 %vm1710_vm13, %v1703_v34 }
 0x4f4   : > { %3018 = vmatpush3.bf16.msra.mxu1 %v3201_v35  ;;  %3019 = vmatprep.mubr.msk.bf16.mxu1 %vm3561_vm2, %v3559_v0 }
 0x4f5   : > { %3023 = vmatprep.subr.bf16.mxu1 %v3559_v0 }
 0x4fb   : > { %3020 = vmatmul.mubr.msk.bf16.vlgmr.msra.gmra.mrb[24].mxu1 %vm1710_vm13, %v1703_v34 }
 0x4fc   : > { %3031 = vmatprep.mubr.msk.bf16.mxu1 %vm3561_vm2, %v3559_v0 }
 0x5be   : > { %v1748_v39 = vpop.f32.mrb[16].mxu1 }
 0x5bf   : > { %v1810_v40 = vcombine.high %v1748_v39, %v1748_v39  ;;  %v1817_v41 = vrot.slane %v1748_v39, %v3971_v18  ;;  %v2989_v42 = vpop.f32.mrb[17].mxu1 }
 0x5c0   : > { %v1751_v44 = vpop.f32.mrb[18].mxu1 }
 0x5c1   : > { %v1824_v45 = vrot.slane %v1810_v40, %v3971_v18  ;;  %v1825_v46 = vcombine.high %v1817_v41, %v1817_v41  ;;  %v1833_v48 = vrot.slane %v1817_v41, %v3971_v18  ;;  %v1859_v49 = vcombine.high %v1751_v44, %v1751_v44  ;;  %v2990_v50 = vpop.f32.mrb[19].mxu1 }
 0x5c2   : > { %v1866_v52 = vrot.slane %v1751_v44, %v3971_v18 }
 0x5c3   : > { %v1826_v53 = vcombine.high %v1824_v45, %v1824_v45  ;;  %v1840_v56 = vrot.slane %v1824_v45, %v3971_v18  ;;  %v1847_v58 = vrot.slane %v1825_v46, %v3971_v18  ;;  %v1855_v59 = vcombine.high %v1833_v48, %v1833_v48 }
 0x5c4   : > { %v1911_v36 = vrot.slane %v1833_v48, %v3977_v26  ;;  %v1873_v51 = vrot.slane %v1859_v49, %v3971_v18  ;;  %v1874_v61 = vcombine.high %v1866_v52, %v1866_v52  ;;  %v1882_v62 = vrot.slane %v1866_v52, %v3971_v18 }
 0x5c5   : > { %v1854_v1 = vrot.slane %v1826_v53, %v3971_v18  ;;  %v1856_v15 = vcombine.high %v1840_v56, %v1840_v56  ;;  %v1857_v22 = vcombine.high %v1847_v58, %v1847_v58  ;;  %v1915_v2 = vrot.slane %v1847_v58, %v3977_v26 }
 0x5c6   : > { %v1919_v4 = vrot.slane %v1855_v59, %v3977_v26  ;;  %v1927_v43 = vrot.slane %v1840_v56, %v3977_v26  ;;  %v1875_v63 = vcombine.high %v1873_v51, %v1873_v51  ;;  %v4191_v6 = vrot.slane %v1873_v51, %v3971_v18  ;;  %v1801_v7 = vpop.f32.mrb[20].mxu1 }
 0x5c7   : > { %v1858_v3 = vcombine.high %v1854_v1, %v1854_v1  ;;  %v1923_v37 = vrot.slane %v1857_v22, %v3977_v26  ;;  %v1931_v11 = vrot.slane %v1854_v1, %v3977_v26  ;;  %v1935_v10 = vrot.slane %v1856_v15, %v3977_v26  ;;  %v2995_v12 = vpop.f32.mrb[21].mxu1 }
 0x5c8   : > { %v1896_v14 = vrot.slane %v1874_v61, %v3971_v18  ;;  %v4198_v9 = vrot.slane %v1875_v63, %v3971_v18  ;;  %v1904_v16 = vcombine.high %v1882_v62, %v1882_v62  ;;  %v1905_v19 = vcombine.high %v4191_v6, %v4191_v6  ;;  %v1804_v20 = vpop.f32.mrb[22].mxu1 }
 0x5c9   : > { %v1939_v21 = vrot.slane %v1858_v3, %v3977_v26  ;;  %v1943_v23 = vrot.slane %v1882_v62, %v3977_v26  ;;  %v1959_v25 = vrot.slane %v4191_v6, %v3977_v26  ;;  %v1802_v27 = vadd.f32 %v2837_v8, %v1801_v7  ;;  %v2996_v57 = vpop.f32.mrb[23].mxu1 }
 0x5ca   : > { %v1906_v55 = vcombine.high %v1896_v14, %v1896_v14  ;;  %v1907_v28 = vcombine.high %v4198_v9, %v4198_v9  ;;  %v1947_v18 = vrot.slane %v1896_v14, %v3977_v26  ;;  %v1951_v29 = vrot.slane %v1904_v16, %v3977_v26 }
 0x5cb   : > { %v1963_v30 = vrot.slane %v4198_v9, %v3977_v26  ;;  %v1967_v13 = vrot.slane %v1905_v19, %v3977_v26  ;;  %v1805_v24 = vadd.f32 %v2837_v8, %v1804_v20  ;;  %v1988_v17 = vadd.f32 %v1911_v36, %v1802_v27 }
 0x5cc   : > { %v1955_v31 = vrot.slane %v1906_v55, %v3977_v26  ;;  %v1971_v47 = vrot.slane %v1907_v28, %v3977_v26  ;;  %v1989_v32 = vadd.f32 %v1915_v2, %v1802_v27  ;;  %v1990_v60 = vadd.f32 %v1919_v4, %v1802_v27 }
 0x5cd   : > { %v2004_v33 = vmul.f32 0.2, %v1988_v17  ;;  %v1991_v5 = vadd.f32 %v1923_v37, %v1802_v27  ;;  %v1992_v34 = vadd.f32 %v1927_v43, %v1802_v27  ;;  %v1993_v35 = vadd.f32 %v1931_v11, %v1802_v27 }
 0x5ce   : > { %v4215_v54 = vpop.f32.mrb[24].mxu1  ;;  %v2005_v38 = vmul.f32 0.2, %v1989_v32  ;;  %v2006_v39 = vmul.f32 0.2, %v1990_v60  ;;  %v1994_v40 = vadd.f32 %v1935_v10, %v1802_v27  ;;  %v1995_v41 = vadd.f32 %v1939_v21, %v1802_v27 }
 0x5cf   : > { %v3021_v42 = vpop.f32.mrb[25].mxu1  ;;  %v2020_v44 = vmax.f32 %v1988_v17, %v2004_v33  ;;  %v2007_v45 = vmul.f32 0.2, %v1991_v5  ;;  %v2008_v46 = vmul.f32 0.2, %v1992_v34  ;;  %v1996_v48 = vadd.f32 %v1943_v23, %v1805_v24  ;;  %v3210_v33 = vld [vmem:[%s4389_s19 + $0x10] sm:$0xff]  }
 0x5d0   : > { %v4217_v49 = vpop.f32.mrb[26].mxu1  ;;  %v2021_v26 = vmax.f32 %v1989_v32, %v2005_v38  ;;  %v2022_v50 = vmax.f32 %v1990_v60, %v2006_v39  ;;  %v2009_v52 = vmul.f32 0.2, %v1993_v35  ;;  %v2010_v53 = vmul.f32 0.2, %v1994_v40  ;;  %v3208_v32 = vld [vmem:[%s4389_s19] sm:$0xff]  }
 0x5d1   : > { %v3022_v56 = vpop.f32.mrb[27].mxu1  ;;  %v2023_v58 = vmax.f32 %v1991_v5, %v2007_v45  ;;  %v2024_v59 = vmax.f32 %v1992_v34, %v2008_v46  ;;  %v2011_v36 = vmul.f32 0.2, %v1995_v41  ;;  %v1997_v51 = vadd.f32 %v1947_v18, %v1805_v24  ;;  %v3209_v60 = vld [vmem:[%s4389_s19 + $0x8] sm:$0xff]   ;;  %v4259_v5 = vld [vmem:[%s4385_s15] ss:$0 sm:$0xff] }
 0x5d2   : > { %v2041_v61 = vpack.c.bf16 %v2021_v26, %v2020_v44  ;;  %v2025_v62 = vmax.f32 %v1993_v35, %v2009_v52  ;;  %v2026_v1 = vmax.f32 %v1994_v40, %v2010_v53  ;;  %v2012_v15 = vmul.f32 0.2, %v1996_v48 }
 0x5d3   : > { %v2042_v22 = vpack.c.bf16 %v2023_v58, %v2022_v50  ;;  %v2027_v2 = vmax.f32 %v1995_v41, %v2011_v36  ;;  %v2013_v4 = vmul.f32 0.2, %v1997_v51  ;;  %v1998_v43 = vadd.f32 %v1951_v29, %v1805_v24 }
 0x5d4   : > { %3001 = vmatprep.mubr.msk.bf16.mxu0 %vm1143_vm4, %v2041_v61  ;;  %v2043_v63 = vpack.c.bf16 %v2025_v62, %v2024_v59  ;;  %v2028_v6 = vmax.f32 %v1996_v48, %v2012_v15  ;;  %v1999_v8 = vadd.f32 %v1955_v31, %v1805_v24  ;;  %v2000_v7 = vadd.f32 %v1959_v25, %v1805_v24 }
 0x5d5   : > { %3002 = vmatmul.mubr.msk.bf16.vlgmr.msra.gmra.mrb[20].mxu0 %vm1143_vm4, %v2042_v22  ;;  %v2044_v3 = vpack.c.bf16 %v2027_v2, %v2026_v1  ;;  %v2029_v37 = vmax.f32 %v1997_v51, %v2013_v4  ;;  %v2014_v11 = vmul.f32 0.2, %v1998_v43  ;;  %v2001_v10 = vadd.f32 %v1963_v30, %v1805_v24  ;;  %v3204_v30 = vld [vmem:[%s4386_s16] sm:$0xff]  }
 0x5d6   : > { %3005 = vmatprep.mubr.msk.bf16.mxu0 %vm1143_vm4, %v2043_v63  ;;  %v2015_v12 = vmul.f32 0.2, %v1999_v8  ;;  %v2016_v14 = vmul.f32 0.2, %v2000_v7  ;;  %v2002_v9 = vadd.f32 %v1967_v13, %v1805_v24  ;;  %v2003_v16 = vadd.f32 %v1971_v47, %v1805_v24  ;;  %3024 = vmatpush3.bf16.msra.mxu1 %v3204_v30  ;;  %v3205_v13 = vld [vmem:[%s4386_s16 + $0x8] sm:$0xff]   ;;  %v3206_v24 = vld [vmem:[%s4386_s16 + $0x10] sm:$0xff]  }
 0x5d7   : > { %v2045_v19 = vpack.c.bf16 %v2029_v37, %v2028_v6  ;;  %v2030_v20 = vmax.f32 %v1998_v43, %v2014_v11  ;;  %v2017_v21 = vmul.f32 0.2, %v2001_v10  ;;  %3025 = vmatprep.subr.bf16.mxu1 %v3559_v0  ;;  %v3207_v47 = vld [vmem:[%s4386_s16 + $0x18] sm:$0xff]   ;;  %3036 = vmatpush3.bf16.msra.mxu0 %v3208_v32 }
 0x5d8   : > { %v2031_v23 = vmax.f32 %v1999_v8, %v2015_v12  ;;  %v2032_v27 = vmax.f32 %v2000_v7, %v2016_v14  ;;  %v2018_v57 = vmul.f32 0.2, %v2002_v9  ;;  %v2019_v55 = vmul.f32 0.2, %v2003_v16  ;;  %3037 = vmatprep.subr.bf16.mxu0 %v3559_v0 }
 0x5d9   : > { %v2033_v25 = vmax.f32 %v2001_v10, %v2017_v21 }
 0x5da   : > { %v2046_v28 = vpack.c.bf16 %v2031_v23, %v2030_v20  ;;  %v2034_v18 = vmax.f32 %v2002_v9, %v2018_v57  ;;  %v2035_v29 = vmax.f32 %v2003_v16, %v2019_v55  ;;  %3026 = vmatpush3.bf16.msra.mxu1 %v3205_v13 }
 0x5db   : > { %v2047_v17 = vpack.c.bf16 %v2033_v25, %v2032_v27  ;;  %3027 = vmatprep.subr.bf16.mxu1 %v3559_v0  ;;  %3038 = vmatpush3.bf16.msra.mxu0 %v3209_v60 }
 0x5dc   : > { %v2048_v31 = vpack.c.bf16 %v2035_v29, %v2034_v18  ;;  %3039 = vmatprep.subr.bf16.mxu0 %v3559_v0 }
 0x5dd   : > { %3006 = vmatmul.mubr.msk.bf16.gmra.mrb[24].mxu0 %vm1143_vm4, %v2044_v3 }
 0x5de   : > { %3009 = vmatprep.mubr.msk.bf16.mxu0 %vm1143_vm4, %v2045_v19  ;;  %3028 = vmatpush3.bf16.msra.mxu1 %v3206_v24 }
 0x5df   : > { %3029 = vmatprep.subr.bf16.mxu1 %v3559_v0  ;;  %3040 = vmatpush3.bf16.msra.mxu0 %v3210_v33 }
 0x5e0   : > { %3041 = vmatprep.subr.bf16.mxu0 %v3559_v0 }
 0x5e2   : > { %3030 = vmatpush3.bf16.msra.mxu1 %v3207_v47 }
 0x5e5   : > { %3010 = vmatmul.mubr.msk.bf16.gmra.mrb[28].mxu0 %vm1143_vm4, %v2046_v28 }
 0x5e6   : > { %3013 = vmatprep.mubr.msk.bf16.mxu0 %vm1143_vm4, %v2047_v17 }
 0x5ed   : > { %3014 = vmatmul.mubr.msk.bf16.gmra.mrb[32].mxu0 %vm1143_vm4, %v2048_v31 }
 0x5ee   : > { %3043 = vmatprep.mubr.msk.bf16.mxu0 %vm3561_vm2, %v3559_v0 }
 0x6a8   : > { %v3003_v34 = vpop.f32.mrb[20].mxu0 }
 0x6a9   : > { %v2134_v35 = vadd.f32 %v3003_v34, %v4259_v5  ;;  %v2125_v38 = vpop.f32.mrb[21].mxu0 }
 0x6aa   : > { %v2126_v39 = vadd.f32 %v4259_v5, %v2125_v38  ;;  %v3004_v40 = vpop.f32.mrb[22].mxu0 }
 0x6ab   : > { %v2190_v41 = vmul.f32 0.2, %v2134_v35  ;;  %v2137_v42 = vadd.f32 %v3004_v40, %v4259_v5  ;;  %v2128_v44 = vpop.f32.mrb[23].mxu0 }
 0x6ac   : > { %v2188_v45 = vmul.f32 0.2, %v2126_v39  ;;  %v2129_v46 = vadd.f32 %v4259_v5, %v2128_v44 }
 0x6ad   : > { %v2206_v0 = vmax.f32 %v2134_v35, %v2190_v41  ;;  %v2191_v48 = vmul.f32 0.2, %v2137_v42 }
 0x6ae   : > { %v2204_v26 = vmax.f32 %v2126_v39, %v2188_v45  ;;  %v2189_v50 = vmul.f32 0.2, %v2129_v46 }
 0x6af   : > { %v2234_v52 = vsel %vm1297_vm5, %v2206_v0, 0.0  ;;  %v2207_v53 = vmax.f32 %v2137_v42, %v2191_v48 }
 0x6b0   : > { %v2235_v56 = vrot.slane %v2234_v52, 4  ;;  %v2220_v58 = vsel %vm1297_vm5, %v2204_v26, 0.0  ;;  %v2205_v59 = vmax.f32 %v2129_v46, %v2189_v50  ;;  %v3007_v36 = vpop.f32.mrb[24].mxu0 }
 0x6b1   : > { %v2221_v51 = vrot.slane %v2220_v58, 4  ;;  %v2241_v61 = vsel %vm1297_vm5, %v2207_v53, 0.0  ;;  %v2150_v62 = vadd.f32 %v3007_v36, %v4259_v5  ;;  %v2141_v1 = vpop.f32.mrb[25].mxu0 }
 0x6b2   : > { %v2236_v15 = vadd.f32 %v2235_v56, %v2234_v52  ;;  %v2242_v22 = vrot.slane %v2241_v61, 4  ;;  %v2227_v2 = vsel %vm1297_vm5, %v2205_v59, 0.0  ;;  %v2142_v4 = vadd.f32 %v4259_v5, %v2141_v1  ;;  %v3008_v43 = vpop.f32.mrb[26].mxu0 }
 0x6b3   : > { %v2222_v63 = vadd.f32 %v2221_v51, %v2220_v58  ;;  %v2228_v6 = vrot.slane %v2227_v2, 4  ;;  %v2194_v8 = vmul.f32 0.2, %v2150_v62  ;;  %v2153_v7 = vadd.f32 %v3008_v43, %v4259_v5  ;;  %v2144_v3 = vpop.f32.mrb[27].mxu0 }
 0x6b4   : > { %v2237_v37 = vrot.slane %v2236_v15, 2  ;;  %v2243_v11 = vadd.f32 %v2242_v22, %v2241_v61  ;;  %v2192_v10 = vmul.f32 0.2, %v2142_v4  ;;  %v2145_v12 = vadd.f32 %v4259_v5, %v2144_v3 }
 0x6b5   : > { %v2223_v14 = vrot.slane %v2222_v63, 2  ;;  %v2229_v9 = vadd.f32 %v2228_v6, %v2227_v2  ;;  %v2210_v16 = vmax.f32 %v2150_v62, %v2194_v8  ;;  %v2195_v19 = vmul.f32 0.2, %v2153_v7 }
 0x6b6   : > { %v2238_v20 = vadd.f32 %v2237_v37, %v2236_v15  ;;  %v2244_v21 = vrot.slane %v2243_v11, 2  ;;  %v2208_v23 = vmax.f32 %v2142_v4, %v2192_v10  ;;  %v2193_v27 = vmul.f32 0.2, %v2145_v12 }
 0x6b7   : > { %v2224_v57 = vadd.f32 %v2223_v14, %v2222_v63  ;;  %v2230_v55 = vrot.slane %v2229_v9, 2  ;;  %v2262_v25 = vsel %vm1297_vm5, %v2210_v16, 0.0  ;;  %v2211_v28 = vmax.f32 %v2153_v7, %v2195_v19 }
 0x6b8   : > { %v2239_v18 = vrot.slane %v2238_v20, 1  ;;  %v2245_v29 = vadd.f32 %v2244_v21, %v2243_v11  ;;  %v2263_v17 = vrot.slane %v2262_v25, 4  ;;  %v2248_v31 = vsel %vm1297_vm5, %v2208_v23, 0.0  ;;  %v3011_v30 = vpop.f32.mrb[28].mxu0 }
 0x6b9   : > { %v2225_v13 = vrot.slane %v2224_v57, 1  ;;  %v2231_v24 = vadd.f32 %v2230_v55, %v2229_v9  ;;  %v2249_v47 = vrot.slane %v2248_v31, 4  ;;  %v2269_v32 = vsel %vm1297_vm5, %v2211_v28, 0.0  ;;  %v2157_v60 = vpop.f32.mrb[29].mxu0 }
 0x6ba   : > { %v2240_v33 = vadd.f32 %v2239_v18, %v2238_v20  ;;  %v2246_v34 = vrot.slane %v2245_v29, 1  ;;  %v2264_v35 = vadd.f32 %v2263_v17, %v2262_v25  ;;  %v2270_v38 = vrot.slane %v2269_v32, 4  ;;  %v3012_v39 = vpop.f32.mrb[30].mxu0 }
 0x6bb   : > { %v2226_v40 = vadd.f32 %v2225_v13, %v2224_v57  ;;  %v2232_v41 = vrot.slane %v2231_v24, 1  ;;  %v2250_v42 = vadd.f32 %v2249_v47, %v2248_v31  ;;  %v2209_v44 = vmax.f32 %v2145_v12, %v2193_v27  ;;  %v2160_v45 = vpop.f32.mrb[31].mxu0 }
 0x6bc   : > { %v2345_v46 = vpack.c.bf16 %v2240_v33, %v2240_v33  ;;  %v2247_v0 = vadd.f32 %v2246_v34, %v2245_v29  ;;  %v2265_v48 = vrot.slane %v2264_v35, 2  ;;  %v2271_v26 = vadd.f32 %v2270_v38, %v2269_v32 }
 0x6bd   : > { %v2343_v50 = vpack.c.bf16 %v2226_v40, %v2226_v40  ;;  %v2233_v52 = vadd.f32 %v2232_v41, %v2231_v24  ;;  %v2251_v53 = vrot.slane %v2250_v42, 2  ;;  %v2255_v56 = vsel %vm1297_vm5, %v2209_v44, 0.0 }
 0x6be   : > { %v2346_v58 = vpack.c.bf16 %v2247_v0, %v2247_v0  ;;  %v2266_v59 = vadd.f32 %v2265_v48, %v2264_v35  ;;  %v2272_v36 = vrot.slane %v2271_v26, 2  ;;  %v2256_v62 = vrot.slane %v2255_v56, 4 }
 0x6bf   : > { %v2344_v51 = vpack.c.bf16 %v2233_v52, %v2233_v52  ;;  %v2252_v61 = vadd.f32 %v2251_v53, %v2250_v42  ;;  %v2424_v1 = vunpack.c.l.b16 %v2345_v46  ;;  %v2422_v15 = vunpack.c.l.b16 %v2343_v50 }
 0x6c0   : > { %v2273_v22 = vadd.f32 %v2272_v36, %v2271_v26  ;;  %v2166_v2 = vadd.f32 %v3011_v30, %v4259_v5  ;;  %v3015_v4 = vpop.f32.mrb[32].mxu0  ;;  %v2257_v6 = vadd.f32 %v2256_v62, %v2255_v56  ;;  %v2158_v8 = vadd.f32 %v4259_v5, %v2157_v60 }
 0x6c1   : > { %v2423_v43 = vunpack.c.l.b16 %v2344_v51  ;;  %v2253_v63 = vrot.slane %v2252_v61, 1  ;;  %v2173_v7 = vpop.f32.mrb[33].mxu0  ;;  %v2425_v3 = vunpack.c.l.b16 %v2346_v58  ;;  %v2267_v37 = vrot.slane %v2266_v59, 1 }
 0x6c2   : > { %v2198_v11 = vmul.f32 0.2, %v2166_v2  ;;  %v2169_v10 = vadd.f32 %v3012_v39, %v4259_v5  ;;  %v3016_v12 = vpop.f32.mrb[34].mxu0  ;;  %v2258_v16 = vrot.slane %v2257_v6, 2  ;;  %v2196_v19 = vmul.f32 0.2, %v2158_v8 }
 0x6c3   : > { %v2438_v14 = vsel %vm1512_vm6, %v2423_v43, %v2422_v15  ;;  %v2254_v9 = vadd.f32 %v2253_v63, %v2252_v61  ;;  %v2176_v20 = vpop.f32.mrb[35].mxu0  ;;  %v2274_v23 = vrot.slane %v2273_v22, 1  ;;  %v2268_v18 = vadd.f32 %v2267_v37, %v2266_v59 }
 0x6c4   : > { %v2439_v21 = vsel %vm1514_vm7, %v2424_v1, %v2438_v14  ;;  %v2214_v27 = vmax.f32 %v2166_v2, %v2198_v11  ;;  %v2259_v25 = vadd.f32 %v2258_v16, %v2257_v6  ;;  %v2212_v28 = vmax.f32 %v2158_v8, %v2196_v19 }
 0x6c5   : > { %v2347_v57 = vpack.c.bf16 %v2254_v9, %v2254_v9  ;;  %v2440_v55 = vsel %vm1516_vm8, %v2425_v3, %v2439_v21  ;;  %v2199_v17 = vmul.f32 0.2, %v2169_v10  ;;  %v2275_v47 = vadd.f32 %v2274_v23, %v2273_v22 }
 0x6c6   : > { %v2290_v29 = vsel %vm1297_vm5, %v2214_v27, 0.0  ;;  %v2260_v30 = vrot.slane %v2259_v25, 1  ;;  %v2276_v24 = vsel %vm1297_vm5, %v2212_v28, 0.0  ;;  %v2161_v33 = vadd.f32 %v4259_v5, %v2160_v45 }
 0x6c7   : > { %v2426_v31 = vunpack.c.l.b16 %v2347_v57  ;;  %v2291_v13 = vrot.slane %v2290_v29, 4  ;;  %v2277_v32 = vrot.slane %v2276_v24, 4  ;;  %v2215_v60 = vmax.f32 %v2169_v10, %v2199_v17 }
 0x6c8   : > { %v2261_v35 = vadd.f32 %v2260_v30, %v2259_v25  ;;  %v2182_v39 = vadd.f32 %v3015_v4, %v4259_v5  ;;  %v2197_v42 = vmul.f32 0.2, %v2161_v33  ;;  %v2174_v44 = vadd.f32 %v4259_v5, %v2173_v7 }
 0x6c9   : > { %v2441_v34 = vsel %vm1518_vm9, %v2426_v31, %v2440_v55  ;;  %v2292_v38 = vadd.f32 %v2291_v13, %v2290_v29  ;;  %v2278_v40 = vadd.f32 %v2277_v32, %v2276_v24  ;;  %v2297_v41 = vsel %vm1297_vm5, %v2215_v60, 0.0 }
 0x6ca   : > { %v2348_v46 = vpack.c.bf16 %v2261_v35, %v2261_v35  ;;  %v2298_v48 = vrot.slane %v2297_v41, 4  ;;  %v2202_v26 = vmul.f32 0.2, %v2182_v39  ;;  %v2213_v52 = vmax.f32 %v2161_v33, %v2197_v42 }
 0x6cb   : > { %v2293_v0 = vrot.slane %v2292_v38, 2  ;;  %v2279_v50 = vrot.slane %v2278_v40, 2  ;;  %v2200_v53 = vmul.f32 0.2, %v2174_v44  ;;  %v2185_v45 = vadd.f32 %v3016_v12, %v4259_v5 }
 0x6cc   : > { %v2427_v56 = vunpack.c.l.b16 %v2348_v46  ;;  %v2299_v59 = vadd.f32 %v2298_v48, %v2297_v41  ;;  %v2218_v36 = vmax.f32 %v2182_v39, %v2202_v26  ;;  %v2283_v61 = vsel %vm1297_vm5, %v2213_v52, 0.0 }
 0x6cd   : > { %v2294_v58 = vadd.f32 %v2293_v0, %v2292_v38  ;;  %v2280_v51 = vadd.f32 %v2279_v50, %v2278_v40  ;;  %v2216_v62 = vmax.f32 %v2174_v44, %v2200_v53  ;;  %v2203_v1 = vmul.f32 0.2, %v2185_v45 }
 0x6ce   : > { %v2349_v15 = vpack.c.bf16 %v2268_v18, %v2268_v18  ;;  %v2442_v22 = vsel %vm1520_vm10, %v2427_v56, %v2441_v34  ;;  %v2300_v2 = vrot.slane %v2299_v59, 2  ;;  %v2284_v4 = vrot.slane %v2283_v61, 4 }
 0x6cf   : > { %v2350_v43 = vpack.c.bf16 %v2275_v47, %v2275_v47  ;;  %v2318_v63 = vsel %vm1297_vm5, %v2218_v36, 0.0  ;;  %v2304_v6 = vsel %vm1297_vm5, %v2216_v62, 0.0  ;;  %v2219_v8 = vmax.f32 %v2185_v45, %v2203_v1 }
 0x6d0   : > { %v2281_v7 = vrot.slane %v2280_v51, 1  ;;  %v2301_v3 = vadd.f32 %v2300_v2, %v2299_v59  ;;  %v2285_v37 = vadd.f32 %v2284_v4, %v2283_v61  ;;  %v2319_v11 = vrot.slane %v2318_v63, 4 }
 0x6d1   : > { %v2295_v10 = vrot.slane %v2294_v58, 1  ;;  %v2305_v12 = vrot.slane %v2304_v6, 4  ;;  %v2325_v14 = vsel %vm1297_vm5, %v2219_v8, 0.0  ;;  %v2177_v9 = vadd.f32 %v4259_v5, %v2176_v20 }
 0x6d2   : > { %v2302_v16 = vrot.slane %v2301_v3, 1  ;;  %v2286_v19 = vrot.slane %v2285_v37, 2  ;;  %v2320_v21 = vadd.f32 %v2319_v11, %v2318_v63  ;;  %v2428_v23 = vunpack.c.l.b16 %v2349_v15 }
 0x6d3   : > { %v2306_v27 = vadd.f32 %v2305_v12, %v2304_v6  ;;  %v2326_v57 = vrot.slane %v2325_v14, 4  ;;  %v2201_v55 = vmul.f32 0.2, %v2177_v9  ;;  %v2429_v25 = vunpack.c.l.b16 %v2350_v43 }
 0x6d4   : > { %v2282_v28 = vadd.f32 %v2281_v7, %v2280_v51  ;;  %v2287_v18 = vadd.f32 %v2286_v19, %v2285_v37  ;;  %v2321_v29 = vrot.slane %v2320_v21, 2  ;;  %v2296_v17 = vadd.f32 %v2295_v10, %v2294_v58 }
 0x6d5   : > { %v2307_v31 = vrot.slane %v2306_v27, 2  ;;  %v2327_v30 = vadd.f32 %v2326_v57, %v2325_v14  ;;  %v2217_v13 = vmax.f32 %v2177_v9, %v2201_v55  ;;  %v2303_v24 = vadd.f32 %v2302_v16, %v2301_v3  ;;  %v3211_v9 = vld [vmem:[%s4389_s19 + $0x18] sm:$0xff]   ;;  %v2858_v16 = vld [vmem:[%s4459_s28] ss:$0 sm:$0xff]  ;;  %s3468_s28 = sshll.u32 %s3563_s4, 4  ;;  %s3469_s28 = int_to_ptr.vmem [resolvable:$false] %s3468_s28 }
 0x6d6   : > { %v2288_v47 = vrot.slane %v2287_v18, 1  ;;  %v2322_v32 = vadd.f32 %v2321_v29, %v2320_v21  ;;  %v2443_v5 = vsel %vm1522_vm11, %v2428_v23, %v2442_v22  ;;  %v2351_v35 = vpack.c.bf16 %v2282_v28, %v2282_v28  ;;  %3042 = vmatpush3.bf16.msra.mxu0 %v3211_v9  ;;  %s3470_s8 = scalar_lea.vmem %s3469_s28, 512  ;;  %p3471_p0 = scmp.lt.s32.totalorder %s4322_s1, %s3469_s28 }
 0x6d7   : > { %v2308_v20 = vadd.f32 %v2307_v31, %v2306_v27  ;;  %v2328_v60 = vrot.slane %v2327_v30, 2  ;;  %v2311_v33 = vsel %vm1297_vm5, %v2217_v13, 0.0  ;;  %v2444_v34 = vsel %vm1524_vm12, %v2429_v25, %v2443_v5  ;;  %p3472_p6 = scmp.lt.s32.totalorder %s3470_s8, %s3464_s3 }
 0x6d8   : > { %v2289_v38 = vadd.f32 %v2288_v47, %v2287_v18  ;;  %v2312_v39 = vrot.slane %v2311_v33, 4  ;;  %v2353_v40 = vpack.c.bf16 %v2296_v17, %v2296_v17  ;;  %v2354_v44 = vpack.c.bf16 %v2303_v24, %v2303_v24 }
 0x6d9   : > { %v2309_v41 = vrot.slane %v2308_v20, 1  ;;  %v2329_v42 = vadd.f32 %v2328_v60, %v2327_v30  ;;  %v2323_v48 = vrot.slane %v2322_v32, 1  ;;  %v2430_v50 = vunpack.c.l.b16 %v2351_v35  ;;  %p3473_p5 = por %p3472_p6, %p3471_p0 }
 0x6da   : > { %v2352_v46 = vpack.c.bf16 %v2289_v38, %v2289_v38  ;;  %v2313_v0 = vadd.f32 %v2312_v39, %v2311_v33  ;;  %v2432_v56 = vunpack.c.l.b16 %v2353_v40  ;;  %v2433_v59 = vunpack.c.l.b16 %v2354_v44 }
 0x6db   : > { %v2310_v26 = vadd.f32 %v2309_v41, %v2308_v20  ;;  %v2330_v53 = vrot.slane %v2329_v42, 1  ;;  %v2324_v62 = vadd.f32 %v2323_v48, %v2322_v32  ;;  %p3474_p9 = pnand %p3473_p5, %p3467_p1 }
 0x6dc   : > { %v2431_v52 = vunpack.c.l.b16 %v2352_v46  ;;  %v2314_v45 = vrot.slane %v2313_v0, 2 }
 0x6dd   : > { %v2355_v58 = vpack.c.bf16 %v2310_v26, %v2310_v26  ;;  %v2331_v22 = vadd.f32 %v2330_v53, %v2329_v42  ;;  %v2357_v63 = vpack.c.bf16 %v2324_v62, %v2324_v62 }
 0x6de   : > { %v2445_v36 = vsel %vm1512_vm6, %v2431_v52, %v2430_v50  ;;  %v2315_v51 = vadd.f32 %v2314_v45, %v2313_v0 }
 0x6df   : > { %v2446_v61 = vsel %vm1514_vm7, %v2432_v56, %v2445_v36  ;;  %v2434_v1 = vunpack.c.l.b16 %v2355_v58  ;;  %v2358_v6 = vpack.c.bf16 %v2331_v22, %v2331_v22  ;;  %v2436_v3 = vunpack.c.l.b16 %v2357_v63 }
 0x6e0   : > { %v2447_v15 = vsel %vm1516_vm8, %v2433_v59, %v2446_v61  ;;  %v2316_v2 = vrot.slane %v2315_v51, 1 }
 0x6e1   : > { %v2448_v4 = vsel %vm1518_vm9, %v2434_v1, %v2447_v15  ;;  %v2437_v37 = vunpack.c.l.b16 %v2358_v6 }
 0x6e2   : > { %v2317_v43 = vadd.f32 %v2316_v2, %v2315_v51 }
 0x6e4   : > { %v2356_v8 = vpack.c.bf16 %v2317_v43, %v2317_v43 }
 0x6e6   : > { %v2435_v7 = vunpack.c.l.b16 %v2356_v8 }
 0x6e8   : > { %v2449_v11 = vsel %vm1520_vm10, %v2435_v7, %v2448_v4 }
 0x6e9   : > { %v2450_v10 = vsel %vm1522_vm11, %v2436_v3, %v2449_v11 }
 0x6ea   : > { %v2451_v12 = vsel %vm1524_vm12, %v2437_v37, %v2450_v10 }
 0x6eb   : > { %v2452_v14 = vpack.c.b16 %v2451_v12, %v2444_v34 }
 0x6ed   : > { %3032 = vmatmul.mubr.msk.bf16.vlgmr.msra.gmra.mrb[28].mxu1 %vm1297_vm5, %v2452_v14 }
 0x7c0   : > { %v2514_v19 = vpop.f32.mrb[28].mxu1 }
 0x7c1   : > { %v2515_v21 = vadd.f32 %v2514_v19, %v4215_v54  ;;  %v3033_v23 = vpop.f32.mrb[29].mxu1  ;;  %v2859_v54 = vld [vmem:[%s4461_s20] ss:$0 sm:$0xff] }
 0x7c2   : > { %v2517_v27 = vpop.f32.mrb[30].mxu1 }
 0x7c3   : > { %v2527_v57 = vadd.f32 %v2858_v16, %v2515_v21  ;;  %v2518_v55 = vadd.f32 %v2517_v27, %v4217_v49  ;;  %v3034_v25 = vpop.f32.mrb[31].mxu1 }
 0x7c5   : > { %v2529_v28 = vmul.f32 0.2, %v2527_v57  ;;  %v2528_v18 = vadd.f32 %v2858_v16, %v2518_v55 }
 0x7c7   : > { %v2530_v29 = vmul.f32 0.2, %v2528_v18  ;;  %v2531_v17 = vmax.f32 %v2527_v57, %v2529_v28 }
 0x7c9   : > { %v2532_v31 = vmax.f32 %v2528_v18, %v2530_v29 }
 0x7cb   : > { %v2542_v30 = vpack.c.bf16 %v2532_v31, %v2531_v17 }
 0x7cd   : > { %3044 = vmatmul.mubr.msk.bf16.vlgmr.msra.gmra.mrb[36].mxu0 %vm1297_vm5, %v2542_v30 }
 0x8a0   : > { %v2610_v49 = vpop.f32.mrb[36].mxu0 }
 0x8a1   : > { %v2611_v13 = vadd.f32 %v2859_v54, %v2610_v49  ;;  %v3045_v24 = vpop.f32.mrb[37].mxu0 }
 0x8a2   : > { %v2613_v47 = vpop.f32.mrb[38].mxu0 }
 0x8a3   : > { %2617 = vst [vmem:[%s767_s18] sm:$0xff] %v2611_v13  ;;  %v2614_v32 = vadd.f32 %v2859_v54, %v2613_v47  ;;  %v3046_v5 = vpop.f32.mrb[39].mxu0 }
 0x8a5   : > { %2618 = vst [vmem:[%s767_s18 + $0x8] sm:$0xff] %v2614_v32 }
 0x8a6   : > { %3477 = shalt.err (!%p3474_p9)
}
 0x8a7   : > { %s3478_s11 = scalar_lea.hbm %s4327_s30, 256  ;;  %s3482_s29 = scalar_lea.hbm %s4463_s0, 512 }
 0x8a8   : > { %p3479_p12 = scmp.ne.s32.totalorder %s4327_s30, %s3478_s11  ;;  %p3483_p3 = scmp.lt.u32.totalorder %s4327_s30, %s4463_s0 }
 0x8a9   : > { %p3484_p4 = scmp.lt.u32.totalorder %s3482_s29, %s3478_s11  ;;  %p3486_p8 = scmp.lt.u32.totalorder %s3478_s11, %s4327_s30 }
 0x8aa   : > { %p3480_p10 = pnand %p3479_p12, %p4464_p11 }
 0x8ab   : > { %p3485_p7 = por %p3484_p4, %p3483_p3 }
 0x8ac   : > { %p3481_p2 = pneg %p3480_p10 }
 0x8ad   : > { %p3487_p13 = por %p3486_p8, %p3485_p7 }
 0x8af   : > { %p3488_p1 = pnand %p3487_p13, %p3481_p2 }
 0x8b1   : > { %3491 = shalt.err (!%p3488_p1)
}
 0x8b2   : > { %s3564_s27 = smov 128   ;;  %s3565_s5 = smov 8  }
 0x8b3   : > { %3087 = dma.vmem_to_hbm [thread:$0]  (%p4464_p11), %s4322_s1, 256, %s4327_s30, %s4329_s23, %s3564_s27, %s3564_s27, %s3565_s5  }
 0x8b4 PF: > { %s4465_s22 = sld [smem:[#allocation27_spill]]  ;;  %s4466_s3 = sld [smem:[#allocation24_spill]] }
 0x8b5   : > { %s4467_s4 = sld [smem:[#allocation31_spill]] }
 0x8ba   : > { %p3139_p0 = scmp.ge.s32.totalorder %s4465_s22, 2  ;;  %s2648_s28 = sand.u32 1, %s4466_s3  }
 0x8bb   : > { %p4468_p6 = scmp.ne.s32.totalorder %s4467_s4, 0  ;;  %s2649_s8 = scalar_lea.sflag [#allocation4], %s2648_s28 }
 0x8bd   : > { %p3118_p5 = pnand %p3139_p0, %p4468_p6 }
 0x8bf   : > { %3529 = dma.done.wait (!%p3118_p5), %s2649_s8, 256  }
 0x8c0   : > { %3531 = vsyncadd (!%p3118_p5), %s2649_s8, 4294967040  ;;  %s4469_s27 = sld [smem:[#allocation28_spill]]  ;;  %s4470_s2 = sld [smem:[#allocation25_spill]] }
 0x8c1   : > { %s4471_s25 = sld [smem:[#allocation26_spill]]  ;;  %s4472_s26 = sld [smem:[#allocation29_spill]] }
 0x8c6   : > { %p36_p9 = scmp.ge.s32.totalorder %s4469_s27, 4  }
 0x8c8   :  { %38 = sbr.rel (!%p36_p9) target bundleno = 20 (0x14), region = 176 }
 0x8cf   :  { %2654 = vsyncpa [#allocation3], 1 }
 0x8d0   :  { %2656 = vsyncpa [#allocation3 + $0x1], 1 }
 0x8d1   :  { %2657 = vsyncpa [#allocation6], 1 }
 0x8d2   :  { %2658 = vsyncpa [#allocation9], 1 }
 0x8d3   :  { %2659 = vsyncpa [#allocation12], 1 }
 0x8d4   :  { %2660 = vsyncpa [#allocation15], 1 }
 0x8d5   :  { %2661 = vsyncpa [#allocation4], 1 }
 0x8d6   :  { %2663 = vsyncpa [#allocation4 + $0x1], 1 }

</bundles_post_ra>
